<compile_context>
chip_gen: v5e
topology: v5e:2x2
jax: 0.10.0
libtpu: 0.0.40
codegen_flags: <defaults>
</compile_context>

<pallas_src>
import jax
import jax.numpy as jnp
from jax.experimental import pallas as pl
from jax.experimental.pallas import tpu as pltpu

NEG_SLOPE = 0.01     # nn.LeakyReLU() default negative_slope
LANES = 128          # padded output-channel width (lane-dense stores / MXU width)
CIN_PAD = 8          # layer-1 input channels padded 3 -> 8
C_OUT_FINAL = 32     # real channel count of the encoder output


def _leaky(v):
    return jnp.where(v >= 0.0, v, NEG_SLOPE * v)


def _conv_out(size, k, s):
    return (size - k) // s + 1


def _pick_batch_block(n):
    """Largest divisor of n (<=16) that still leaves >=2 grid steps (v7x: 2 TCs)."""
    best = 1
    for d in range(1, min(n, 16) + 1):
        if n % d == 0 and (n // d >= 2 or n == 1):
            best = d
    return best


# ----------------------------- fused Pallas kernel ---------------------------
def _make_encoder_kernel(h_in, w_in, b_blk):
    """Build the fused 4-layer encoder kernel for an (h_in, w_in) input."""
    assert h_in % 2 == 0 and w_in % 2 == 0, "kernel assumes even input H/W"
    H1, W1 = _conv_out(h_in, 3, 2), _conv_out(w_in, 3, 2)        # after l1
    assert H1 >= 2 and W1 >= 2, "ReflectionPad2d(1) needs layer-1 output >= 2x2"
    H1p, W1p = H1 + 2, W1 + 2                                    # after ReflectionPad2d(1)
    H2, W2 = _conv_out(H1p, 2, 2), _conv_out(W1p, 2, 2)          # after l2
    H3, W3 = _conv_out(H2, 2, 1), _conv_out(W2, 2, 1)            # after l3 (== l4)
    B = b_blk

    def _deinterleave_cols(t):
        # Split the W (second-minor) axis into even/odd column planes using only
        # unit-width static slices + concat (no strided ref/value slicing).
        wdim = t.shape[2]
        ev = jnp.concatenate(
            [t[:, :, 2 * k:2 * k + 1, :] for k in range((wdim + 1) // 2)], axis=2)
        od = jnp.concatenate(
            [t[:, :, 2 * k + 1:2 * k + 2, :] for k in range(wdim // 2)], axis=2)
        return ev, od

    def kernel(x_ref, w1_ref, b1_ref, w2_ref, b2_ref, w3_ref, b3_ref,
               w4_ref, b4_ref, o_ref):
        # ---------------- layer 1: Conv2d(3->16, k=3, s=2) + LeakyReLU -------------
        x = x_ref[...]                                           # (B, H, W, 8) f32
        xe, xo = _deinterleave_cols(x)                           # even / odd columns
        xe = xe.reshape(B, h_in // 2, 2, w_in // 2, CIN_PAD)     # leading-dim split (free)
        xo = xo.reshape(B, h_in // 2, 2, w_in // 2, CIN_PAD)
        taps1 = []
        for i in range(3):
            for j in range(3):
                src = xe if (j % 2 == 0) else xo
                taps1.append(
                    src[:, i // 2:i // 2 + H1, i % 2, j // 2:j // 2 + W1, :])
        lhs1 = jnp.concatenate(taps1, axis=-1)                   # (B, H1, W1, 72)
        lhs1 = lhs1.reshape(B * H1 * W1, 9 * CIN_PAD).astype(jnp.bfloat16)
        a1 = jnp.dot(lhs1, w1_ref[...], preferred_element_type=jnp.float32)
        a1 = _leaky(a1 + b1_ref[...]).reshape(B, H1, W1, LANES)  # f32

        # ---------------- ReflectionPad2d(1), purely functional in VMEM ------------
        a1p = jnp.concatenate([a1[:, 1:2], a1, a1[:, H1 - 2:H1 - 1]], axis=1)
        a1p = jnp.concatenate([a1p[:, :, 1:2], a1p, a1p[:, :, W1 - 2:W1 - 1]], axis=2)
        # a1p: (B, H1p, W1p, 128)

        # ---------------- layer 2: Conv2d(16->32, k=2, s=2) + LeakyReLU ------------
        pe, po = _deinterleave_cols(a1p)
        pe = pe[:, :2 * H2].reshape(B, H2, 2, pe.shape[2], LANES)
        po = po[:, :2 * H2].reshape(B, H2, 2, po.shape[2], LANES)
        taps2 = []
        for i in range(2):
            for j in range(2):
                src = pe if j == 0 else po
                taps2.append(src[:, :, i, 0:W2, :])              # (B, H2, W2, 128)
        lhs2 = jnp.concatenate(taps2, axis=-1)                   # (B, H2, W2, 512)
        lhs2 = lhs2.reshape(B * H2 * W2, 4 * LANES).astype(jnp.bfloat16)
        a2 = jnp.dot(lhs2, w2_ref[...], preferred_element_type=jnp.float32)
        a2 = _leaky(a2 + b2_ref[...]).reshape(B, H2, W2, LANES)

        # ---------------- layer 3: Conv2d(32->32, k=2, s=1) + LeakyReLU ------------
        taps3 = [a2[:, i:i + H3, j:j + W3, :] for i in range(2) for j in range(2)]
        lhs3 = jnp.concatenate(taps3, axis=-1)                   # (B, H3, W3, 512)
        lhs3 = lhs3.reshape(B * H3 * W3, 4 * LANES).astype(jnp.bfloat16)
        a3 = jnp.dot(lhs3, w3_ref[...], preferred_element_type=jnp.float32)
        a3 = _leaky(a3 + b3_ref[...])                            # (B*H3*W3, 128)

        # ---------------- layer 4: Conv2d(32->32, k=1, s=1) + LeakyReLU ------------
        a4 = jnp.dot(a3.astype(jnp.bfloat16), w4_ref[...],
                     preferred_element_type=jnp.float32)
        a4 = _leaky(a4 + b4_ref[...])

        # One lane/sublane-dense store for the whole block.
        o_ref[...] = a4.reshape(B, H3 * W3, LANES)

    dims = dict(H1=H1, W1=W1, H1p=H1p, W1p=W1p, H2=H2, W2=W2, H3=H3, W3=W3)
    return kernel, dims


# ------------------------- one-time weight packing ----------------------------
def _pack_conv(w_oihw, bias, cin_pad, cout_pad):
    """PyTorch (C_out, C_in, kh, kw) -> tap-major (kh*kw*cin_pad, cout_pad) bf16 slab."""
    c_out, c_in, kh, kw = w_oihw.shape
    wt = jnp.transpose(w_oihw, (2, 3, 1, 0))                     # (kh, kw, c_in, c_out)
    wt = jnp.pad(wt, ((0, 0), (0, 0), (0, cin_pad - c_in), (0, cout_pad - c_out)))
    wt = wt.reshape(kh * kw * cin_pad, cout_pad).astype(jnp.bfloat16)
    b = jnp.pad(bias, (0, cout_pad - c_out)).reshape(1, cout_pad).astype(jnp.float32)
    return wt, b


def pack_params(params):
    """One-time packing (hoisted out of the forward pass)."""
    packed = {}
    packed["w1"], packed["b1"] = _pack_conv(params["w1"], params["b1"], CIN_PAD, LANES)
    packed["w2"], packed["b2"] = _pack_conv(params["w2"], params["b2"], LANES, LANES)
    packed["w3"], packed["b3"] = _pack_conv(params["w3"], params["b3"], LANES, LANES)
    packed["w4"], packed["b4"] = _pack_conv(params["w4"], params["b4"], LANES, LANES)
    return packed


# --------------------------------- forward ------------------------------------
@jax.jit
def encoder_forward(x_nchw, packed):
    """Forward pass matching the PyTorch Encoder: NCHW f32 in, NCHW f32 out."""
    n, c, h, w = x_nchw.shape
    b_blk = _pick_batch_block(n)
    kernel, d = _make_encoder_kernel(h, w, b_blk)

    # TODO(synk): if the up/downstream accepts NHWC, drop this transpose/pad/slice glue
    # and feed/return the kernel's native layout directly.
    x = jnp.transpose(x_nchw, (0, 2, 3, 1)).astype(jnp.float32)
    x = jnp.pad(x, ((0, 0), (0, 0), (0, 0), (0, CIN_PAD - c)))

    out2d = pl.pallas_call(
        kernel,
        out_shape=jax.ShapeDtypeStruct((n, d["H3"] * d["W3"], LANES), jnp.float32),
        grid=(n // b_blk,),
        in_specs=[
            pl.BlockSpec((b_blk, h, w, CIN_PAD), lambda g: (g, 0, 0, 0)),   # x
            pl.BlockSpec((9 * CIN_PAD, LANES), lambda g: (0, 0)),           # w1 packed
            pl.BlockSpec((1, LANES), lambda g: (0, 0)),                     # b1
            pl.BlockSpec((4 * LANES, LANES), lambda g: (0, 0)),             # w2 packed
            pl.BlockSpec((1, LANES), lambda g: (0, 0)),                     # b2
            pl.BlockSpec((4 * LANES, LANES), lambda g: (0, 0)),             # w3 packed
            pl.BlockSpec((1, LANES), lambda g: (0, 0)),                     # b3
            pl.BlockSpec((LANES, LANES), lambda g: (0, 0)),                 # w4 packed
            pl.BlockSpec((1, LANES), lambda g: (0, 0)),                     # b4
        ],
        out_specs=pl.BlockSpec((b_blk, d["H3"] * d["W3"], LANES),
                               lambda g: (g, 0, 0)),
        compiler_params=pltpu.CompilerParams(
            dimension_semantics=("parallel",),      # shards batch blocks on v7x's 2 TCs
            vmem_limit_bytes=32 * 1024 * 1024,
        ),
    )(x, packed["w1"], packed["b1"], packed["w2"], packed["b2"],
      packed["w3"], packed["b3"], packed["w4"], packed["b4"])

    # Drop zero-padded channels, return NCHW like the PyTorch module.
    out = out2d.reshape(n, d["H3"], d["W3"], LANES)[..., :C_OUT_FINAL]
    return jnp.transpose(out, (0, 3, 1, 2))


# ------------------------- params / reference / main --------------------------
def init_params(key):
    """Deterministic init mirroring PyTorch Conv2d shapes (kaiming-uniform style)."""
    shapes = {"w1": (16, 3, 3, 3), "w2": (32, 16, 2, 2),
              "w3": (32, 32, 2, 2), "w4": (32, 32, 1, 1)}
    params = {}
    for name, shp in shapes.items():
        c_out, c_in, kh, kw = shp
        bound = 1.0 / jnp.sqrt(c_in * kh * kw)
        key, k_w, k_b = jax.random.split(key, 3)
        params[name] = jax.random.uniform(k_w, shp, jnp.float32, -bound, bound)
        params["b" + name[1:]] = jax.random.uniform(
            k_b, (c_out,), jnp.float32, -bound, bound)
    return params


def _reference_forward(x_nchw, params):
    """Plain-XLA reference mirroring the PyTorch module (self-check only)."""
    def conv(x, w, b, stride):
        y = jax.lax.conv_general_dilated(
            x, w, window_strides=(stride, stride), padding="VALID",
            dimension_numbers=("NCHW", "OIHW", "NCHW"))
        y = y + b.reshape(1, -1, 1, 1)
        return jnp.where(y >= 0.0, y, NEG_SLOPE * y)

    x = conv(x_nchw, params["w1"], params["b1"], 2)
    x = jnp.pad(x, ((0, 0), (0, 0), (1, 1), (1, 1)), mode="reflect")
    x = conv(x, params["w2"], params["b2"], 2)
    x = conv(x, params["w3"], params["b3"], 1)
    x = conv(x, params["w4"], params["b4"], 1)
    return x


if __name__ == "__main__":
    key = jax.random.PRNGKey(0)
    k_x, k_p = jax.random.split(key)
    x = jax.random.normal(k_x, (2, 3, 16, 16), dtype=jnp.float32)   # NCHW input
    params = init_params(k_p)
    packed = pack_params(params)     # one-time weight packing (not per forward)

    out = jax.block_until_ready(encoder_forward(x, packed))

    # Expected: l1 -> (2,16,7,7), pad -> 9x9, l2 -> (2,32,4,4), l3/l4 -> (2,32,3,3)
    assert out.shape == (2, 32, 3, 3), out.shape
    assert out.dtype == jnp.float32

    ref = jax.block_until_ready(_reference_forward(x, params))
    max_err = float(jnp.max(jnp.abs(out - ref)))
    # 5e-2 tolerance covers the bf16 MXU operands (accumulation stays f32).
    assert max_err < 5e-2, f"max abs err vs reference: {max_err}"

    print("KERNEL_OK")
</pallas_src>

<mosaic_0001>
module attributes {stable_mosaic.version = 11 : i64} {
  func.func @kernel(%arg0: i32, %arg1: memref<1x16x16x8xf32, #tpu.memory_space<vmem>>, %arg2: memref<72x128xbf16, #tpu.memory_space<vmem>>, %arg3: memref<1x128xf32, #tpu.memory_space<vmem>>, %arg4: memref<512x128xbf16, #tpu.memory_space<vmem>>, %arg5: memref<1x128xf32, #tpu.memory_space<vmem>>, %arg6: memref<512x128xbf16, #tpu.memory_space<vmem>>, %arg7: memref<1x128xf32, #tpu.memory_space<vmem>>, %arg8: memref<128x128xbf16, #tpu.memory_space<vmem>>, %arg9: memref<1x128xf32, #tpu.memory_space<vmem>>, %arg10: memref<1x9x128xf32, #tpu.memory_space<vmem>>) attributes {dimension_semantics = [#tpu.dimension_semantics<parallel>], iteration_bounds = array<i64: 2>, scalar_prefetch = 0 : i64, scratch_operands = 0 : i64, tpu.core_type = #tpu.core_type<tc>, window_params = [{transform_indices = @transform_0, window_bounds = array<i64: 1, 16, 16, 8>}, {pipeline_mode = #tpu.pipeline_mode<synchronous>, transform_indices = @transform_1, window_bounds = array<i64: 72, 128>}, {pipeline_mode = #tpu.pipeline_mode<synchronous>, transform_indices = @transform_2, window_bounds = array<i64: 1, 128>}, {pipeline_mode = #tpu.pipeline_mode<synchronous>, transform_indices = @transform_3, window_bounds = array<i64: 512, 128>}, {pipeline_mode = #tpu.pipeline_mode<synchronous>, transform_indices = @transform_4, window_bounds = array<i64: 1, 128>}, {pipeline_mode = #tpu.pipeline_mode<synchronous>, transform_indices = @transform_5, window_bounds = array<i64: 512, 128>}, {pipeline_mode = #tpu.pipeline_mode<synchronous>, transform_indices = @transform_6, window_bounds = array<i64: 1, 128>}, {pipeline_mode = #tpu.pipeline_mode<synchronous>, transform_indices = @transform_7, window_bounds = array<i64: 128, 128>}, {pipeline_mode = #tpu.pipeline_mode<synchronous>, transform_indices = @transform_8, window_bounds = array<i64: 1, 128>}, {transform_indices = @transform_9, window_bounds = array<i64: 1, 9, 128>}]} {
    %c0 = arith.constant 0 : index
    %c0_0 = arith.constant 0 : index
    %c0_1 = arith.constant 0 : index
    %c0_2 = arith.constant 0 : index
    %0 = vector.load %arg1[%c0, %c0_0, %c0_1, %c0_2] : memref<1x16x16x8xf32, #tpu.memory_space<vmem>>, vector<1x16x16x8xf32>
    %1 = vector.extract_strided_slice %0 {offsets = [0, 0, 0, 0], sizes = [1, 16, 1, 8], strides = [1, 1, 1, 1]} : vector<1x16x16x8xf32> to vector<1x16x1x8xf32>
    %2 = vector.extract_strided_slice %0 {offsets = [0, 0, 2, 0], sizes = [1, 16, 1, 8], strides = [1, 1, 1, 1]} : vector<1x16x16x8xf32> to vector<1x16x1x8xf32>
    %3 = vector.extract_strided_slice %0 {offsets = [0, 0, 4, 0], sizes = [1, 16, 1, 8], strides = [1, 1, 1, 1]} : vector<1x16x16x8xf32> to vector<1x16x1x8xf32>
    %4 = vector.extract_strided_slice %0 {offsets = [0, 0, 6, 0], sizes = [1, 16, 1, 8], strides = [1, 1, 1, 1]} : vector<1x16x16x8xf32> to vector<1x16x1x8xf32>
    %5 = vector.extract_strided_slice %0 {offsets = [0, 0, 8, 0], sizes = [1, 16, 1, 8], strides = [1, 1, 1, 1]} : vector<1x16x16x8xf32> to vector<1x16x1x8xf32>
    %6 = vector.extract_strided_slice %0 {offsets = [0, 0, 10, 0], sizes = [1, 16, 1, 8], strides = [1, 1, 1, 1]} : vector<1x16x16x8xf32> to vector<1x16x1x8xf32>
    %7 = vector.extract_strided_slice %0 {offsets = [0, 0, 12, 0], sizes = [1, 16, 1, 8], strides = [1, 1, 1, 1]} : vector<1x16x16x8xf32> to vector<1x16x1x8xf32>
    %8 = vector.extract_strided_slice %0 {offsets = [0, 0, 14, 0], sizes = [1, 16, 1, 8], strides = [1, 1, 1, 1]} : vector<1x16x16x8xf32> to vector<1x16x1x8xf32>
    %9 = tpu.concatenate %1, %2, %3, %4, %5, %6, %7, %8 in 2 : vector<1x16x1x8xf32>, vector<1x16x1x8xf32>, vector<1x16x1x8xf32>, vector<1x16x1x8xf32>, vector<1x16x1x8xf32>, vector<1x16x1x8xf32>, vector<1x16x1x8xf32>, vector<1x16x1x8xf32> -> vector<1x16x8x8xf32>
    %10 = vector.extract_strided_slice %0 {offsets = [0, 0, 1, 0], sizes = [1, 16, 1, 8], strides = [1, 1, 1, 1]} : vector<1x16x16x8xf32> to vector<1x16x1x8xf32>
    %11 = vector.extract_strided_slice %0 {offsets = [0, 0, 3, 0], sizes = [1, 16, 1, 8], strides = [1, 1, 1, 1]} : vector<1x16x16x8xf32> to vector<1x16x1x8xf32>
    %12 = vector.extract_strided_slice %0 {offsets = [0, 0, 5, 0], sizes = [1, 16, 1, 8], strides = [1, 1, 1, 1]} : vector<1x16x16x8xf32> to vector<1x16x1x8xf32>
    %13 = vector.extract_strided_slice %0 {offsets = [0, 0, 7, 0], sizes = [1, 16, 1, 8], strides = [1, 1, 1, 1]} : vector<1x16x16x8xf32> to vector<1x16x1x8xf32>
    %14 = vector.extract_strided_slice %0 {offsets = [0, 0, 9, 0], sizes = [1, 16, 1, 8], strides = [1, 1, 1, 1]} : vector<1x16x16x8xf32> to vector<1x16x1x8xf32>
    %15 = vector.extract_strided_slice %0 {offsets = [0, 0, 11, 0], sizes = [1, 16, 1, 8], strides = [1, 1, 1, 1]} : vector<1x16x16x8xf32> to vector<1x16x1x8xf32>
    %16 = vector.extract_strided_slice %0 {offsets = [0, 0, 13, 0], sizes = [1, 16, 1, 8], strides = [1, 1, 1, 1]} : vector<1x16x16x8xf32> to vector<1x16x1x8xf32>
    %17 = vector.extract_strided_slice %0 {offsets = [0, 0, 15, 0], sizes = [1, 16, 1, 8], strides = [1, 1, 1, 1]} : vector<1x16x16x8xf32> to vector<1x16x1x8xf32>
    %18 = tpu.concatenate %10, %11, %12, %13, %14, %15, %16, %17 in 2 : vector<1x16x1x8xf32>, vector<1x16x1x8xf32>, vector<1x16x1x8xf32>, vector<1x16x1x8xf32>, vector<1x16x1x8xf32>, vector<1x16x1x8xf32>, vector<1x16x1x8xf32>, vector<1x16x1x8xf32> -> vector<1x16x8x8xf32>
    %19 = vector.shape_cast %9 : vector<1x16x8x8xf32> to vector<1x8x2x8x8xf32>
    %20 = vector.shape_cast %18 : vector<1x16x8x8xf32> to vector<1x8x2x8x8xf32>
    %21 = vector.extract_strided_slice %19 {offsets = [0, 0, 0, 0, 0], sizes = [1, 7, 1, 7, 8], strides = [1, 1, 1, 1, 1]} : vector<1x8x2x8x8xf32> to vector<1x7x1x7x8xf32>
    %22 = vector.shape_cast %21 : vector<1x7x1x7x8xf32> to vector<1x7x7x8xf32>
    %23 = vector.extract_strided_slice %20 {offsets = [0, 0, 0, 0, 0], sizes = [1, 7, 1, 7, 8], strides = [1, 1, 1, 1, 1]} : vector<1x8x2x8x8xf32> to vector<1x7x1x7x8xf32>
    %24 = vector.shape_cast %23 : vector<1x7x1x7x8xf32> to vector<1x7x7x8xf32>
    %25 = vector.extract_strided_slice %19 {offsets = [0, 0, 0, 1, 0], sizes = [1, 7, 1, 7, 8], strides = [1, 1, 1, 1, 1]} : vector<1x8x2x8x8xf32> to vector<1x7x1x7x8xf32>
    %26 = vector.shape_cast %25 : vector<1x7x1x7x8xf32> to vector<1x7x7x8xf32>
    %27 = vector.extract_strided_slice %19 {offsets = [0, 0, 1, 0, 0], sizes = [1, 7, 1, 7, 8], strides = [1, 1, 1, 1, 1]} : vector<1x8x2x8x8xf32> to vector<1x7x1x7x8xf32>
    %28 = vector.shape_cast %27 : vector<1x7x1x7x8xf32> to vector<1x7x7x8xf32>
    %29 = vector.extract_strided_slice %20 {offsets = [0, 0, 1, 0, 0], sizes = [1, 7, 1, 7, 8], strides = [1, 1, 1, 1, 1]} : vector<1x8x2x8x8xf32> to vector<1x7x1x7x8xf32>
    %30 = vector.shape_cast %29 : vector<1x7x1x7x8xf32> to vector<1x7x7x8xf32>
    %31 = vector.extract_strided_slice %19 {offsets = [0, 0, 1, 1, 0], sizes = [1, 7, 1, 7, 8], strides = [1, 1, 1, 1, 1]} : vector<1x8x2x8x8xf32> to vector<1x7x1x7x8xf32>
    %32 = vector.shape_cast %31 : vector<1x7x1x7x8xf32> to vector<1x7x7x8xf32>
    %33 = vector.extract_strided_slice %19 {offsets = [0, 1, 0, 0, 0], sizes = [1, 7, 1, 7, 8], strides = [1, 1, 1, 1, 1]} : vector<1x8x2x8x8xf32> to vector<1x7x1x7x8xf32>
    %34 = vector.shape_cast %33 : vector<1x7x1x7x8xf32> to vector<1x7x7x8xf32>
    %35 = vector.extract_strided_slice %20 {offsets = [0, 1, 0, 0, 0], sizes = [1, 7, 1, 7, 8], strides = [1, 1, 1, 1, 1]} : vector<1x8x2x8x8xf32> to vector<1x7x1x7x8xf32>
    %36 = vector.shape_cast %35 : vector<1x7x1x7x8xf32> to vector<1x7x7x8xf32>
    %37 = vector.extract_strided_slice %19 {offsets = [0, 1, 0, 1, 0], sizes = [1, 7, 1, 7, 8], strides = [1, 1, 1, 1, 1]} : vector<1x8x2x8x8xf32> to vector<1x7x1x7x8xf32>
    %38 = vector.shape_cast %37 : vector<1x7x1x7x8xf32> to vector<1x7x7x8xf32>
    %39 = tpu.concatenate %22, %24, %26, %28, %30, %32, %34, %36, %38 in 3 : vector<1x7x7x8xf32>, vector<1x7x7x8xf32>, vector<1x7x7x8xf32>, vector<1x7x7x8xf32>, vector<1x7x7x8xf32>, vector<1x7x7x8xf32>, vector<1x7x7x8xf32>, vector<1x7x7x8xf32>, vector<1x7x7x8xf32> -> vector<1x7x7x72xf32>
    %40 = vector.shape_cast %39 : vector<1x7x7x72xf32> to vector<49x72xf32>
    %41 = arith.truncf %40 : vector<49x72xf32> to vector<49x72xbf16>
    %c0_3 = arith.constant 0 : index
    %c0_4 = arith.constant 0 : index
    %42 = vector.load %arg2[%c0_3, %c0_4] : memref<72x128xbf16, #tpu.memory_space<vmem>>, vector<72x128xbf16>
    %cst = arith.constant dense<0.000000e+00> : vector<49x128xf32>
    %43 = tpu.matmul %41, %42, %cst {dimension_numbers = #tpu.dot_dimension_numbers<[1], [0], [0], [1], [0, 0, 1, 1], [], []>} : vector<49x72xbf16>, vector<72x128xbf16>, vector<49x128xf32> -> vector<49x128xf32>
    %c0_5 = arith.constant 0 : index
    %c0_6 = arith.constant 0 : index
    %44 = vector.load %arg3[%c0_5, %c0_6] : memref<1x128xf32, #tpu.memory_space<vmem>>, vector<1x128xf32>
    %45 = vector.broadcast %44 : vector<1x128xf32> to vector<49x128xf32>
    %46 = arith.addf %43, %45 : vector<49x128xf32>
    %cst_7 = arith.constant 0.000000e+00 : f32
    %47 = vector.broadcast %cst_7 : f32 to vector<49x128xf32>
    %48 = arith.cmpf oge, %46, %47 : vector<49x128xf32>
    %cst_8 = arith.constant 0.00999999977 : f32
    %49 = vector.broadcast %cst_8 : f32 to vector<49x128xf32>
    %50 = arith.mulf %49, %46 : vector<49x128xf32>
    %51 = arith.select %48, %46, %50 : vector<49x128xi1>, vector<49x128xf32>
    %52 = vector.shape_cast %51 : vector<49x128xf32> to vector<1x7x7x128xf32>
    %53 = vector.extract_strided_slice %52 {offsets = [0, 1, 0, 0], sizes = [1, 1, 7, 128], strides = [1, 1, 1, 1]} : vector<1x7x7x128xf32> to vector<1x1x7x128xf32>
    %54 = vector.extract_strided_slice %52 {offsets = [0, 5, 0, 0], sizes = [1, 1, 7, 128], strides = [1, 1, 1, 1]} : vector<1x7x7x128xf32> to vector<1x1x7x128xf32>
    %55 = tpu.concatenate %53, %52, %54 in 1 : vector<1x1x7x128xf32>, vector<1x7x7x128xf32>, vector<1x1x7x128xf32> -> vector<1x9x7x128xf32>
    %56 = vector.extract_strided_slice %55 {offsets = [0, 0, 1, 0], sizes = [1, 9, 1, 128], strides = [1, 1, 1, 1]} : vector<1x9x7x128xf32> to vector<1x9x1x128xf32>
    %57 = vector.extract_strided_slice %55 {offsets = [0, 0, 5, 0], sizes = [1, 9, 1, 128], strides = [1, 1, 1, 1]} : vector<1x9x7x128xf32> to vector<1x9x1x128xf32>
    %58 = tpu.concatenate %56, %55, %57 in 2 : vector<1x9x1x128xf32>, vector<1x9x7x128xf32>, vector<1x9x1x128xf32> -> vector<1x9x9x128xf32>
    %59 = vector.extract_strided_slice %58 {offsets = [0, 0, 0, 0], sizes = [1, 9, 1, 128], strides = [1, 1, 1, 1]} : vector<1x9x9x128xf32> to vector<1x9x1x128xf32>
    %60 = vector.extract_strided_slice %58 {offsets = [0, 0, 2, 0], sizes = [1, 9, 1, 128], strides = [1, 1, 1, 1]} : vector<1x9x9x128xf32> to vector<1x9x1x128xf32>
    %61 = vector.extract_strided_slice %58 {offsets = [0, 0, 4, 0], sizes = [1, 9, 1, 128], strides = [1, 1, 1, 1]} : vector<1x9x9x128xf32> to vector<1x9x1x128xf32>
    %62 = vector.extract_strided_slice %58 {offsets = [0, 0, 6, 0], sizes = [1, 9, 1, 128], strides = [1, 1, 1, 1]} : vector<1x9x9x128xf32> to vector<1x9x1x128xf32>
    %63 = vector.extract_strided_slice %58 {offsets = [0, 0, 8, 0], sizes = [1, 9, 1, 128], strides = [1, 1, 1, 1]} : vector<1x9x9x128xf32> to vector<1x9x1x128xf32>
    %64 = tpu.concatenate %59, %60, %61, %62, %63 in 2 : vector<1x9x1x128xf32>, vector<1x9x1x128xf32>, vector<1x9x1x128xf32>, vector<1x9x1x128xf32>, vector<1x9x1x128xf32> -> vector<1x9x5x128xf32>
    %65 = vector.extract_strided_slice %58 {offsets = [0, 0, 1, 0], sizes = [1, 9, 1, 128], strides = [1, 1, 1, 1]} : vector<1x9x9x128xf32> to vector<1x9x1x128xf32>
    %66 = vector.extract_strided_slice %58 {offsets = [0, 0, 3, 0], sizes = [1, 9, 1, 128], strides = [1, 1, 1, 1]} : vector<1x9x9x128xf32> to vector<1x9x1x128xf32>
    %67 = vector.extract_strided_slice %58 {offsets = [0, 0, 5, 0], sizes = [1, 9, 1, 128], strides = [1, 1, 1, 1]} : vector<1x9x9x128xf32> to vector<1x9x1x128xf32>
    %68 = vector.extract_strided_slice %58 {offsets = [0, 0, 7, 0], sizes = [1, 9, 1, 128], strides = [1, 1, 1, 1]} : vector<1x9x9x128xf32> to vector<1x9x1x128xf32>
    %69 = tpu.concatenate %65, %66, %67, %68 in 2 : vector<1x9x1x128xf32>, vector<1x9x1x128xf32>, vector<1x9x1x128xf32>, vector<1x9x1x128xf32> -> vector<1x9x4x128xf32>
    %70 = vector.extract_strided_slice %64 {offsets = [0, 0, 0, 0], sizes = [1, 8, 5, 128], strides = [1, 1, 1, 1]} : vector<1x9x5x128xf32> to vector<1x8x5x128xf32>
    %71 = vector.shape_cast %70 : vector<1x8x5x128xf32> to vector<1x4x2x5x128xf32>
    %72 = vector.extract_strided_slice %69 {offsets = [0, 0, 0, 0], sizes = [1, 8, 4, 128], strides = [1, 1, 1, 1]} : vector<1x9x4x128xf32> to vector<1x8x4x128xf32>
    %73 = vector.shape_cast %72 : vector<1x8x4x128xf32> to vector<1x4x2x4x128xf32>
    %74 = vector.extract_strided_slice %71 {offsets = [0, 0, 0, 0, 0], sizes = [1, 4, 1, 4, 128], strides = [1, 1, 1, 1, 1]} : vector<1x4x2x5x128xf32> to vector<1x4x1x4x128xf32>
    %75 = vector.shape_cast %74 : vector<1x4x1x4x128xf32> to vector<1x4x4x128xf32>
    %76 = vector.extract_strided_slice %73 {offsets = [0, 0, 0, 0, 0], sizes = [1, 4, 1, 4, 128], strides = [1, 1, 1, 1, 1]} : vector<1x4x2x4x128xf32> to vector<1x4x1x4x128xf32>
    %77 = vector.shape_cast %76 : vector<1x4x1x4x128xf32> to vector<1x4x4x128xf32>
    %78 = vector.extract_strided_slice %71 {offsets = [0, 0, 1, 0, 0], sizes = [1, 4, 1, 4, 128], strides = [1, 1, 1, 1, 1]} : vector<1x4x2x5x128xf32> to vector<1x4x1x4x128xf32>
    %79 = vector.shape_cast %78 : vector<1x4x1x4x128xf32> to vector<1x4x4x128xf32>
    %80 = vector.extract_strided_slice %73 {offsets = [0, 0, 1, 0, 0], sizes = [1, 4, 1, 4, 128], strides = [1, 1, 1, 1, 1]} : vector<1x4x2x4x128xf32> to vector<1x4x1x4x128xf32>
    %81 = vector.shape_cast %80 : vector<1x4x1x4x128xf32> to vector<1x4x4x128xf32>
    %82 = tpu.concatenate %75, %77, %79, %81 in 3 : vector<1x4x4x128xf32>, vector<1x4x4x128xf32>, vector<1x4x4x128xf32>, vector<1x4x4x128xf32> -> vector<1x4x4x512xf32>
    %83 = vector.shape_cast %82 : vector<1x4x4x512xf32> to vector<16x512xf32>
    %84 = arith.truncf %83 : vector<16x512xf32> to vector<16x512xbf16>
    %c0_9 = arith.constant 0 : index
    %c0_10 = arith.constant 0 : index
    %85 = vector.load %arg4[%c0_9, %c0_10] : memref<512x128xbf16, #tpu.memory_space<vmem>>, vector<512x128xbf16>
    %cst_11 = arith.constant dense<0.000000e+00> : vector<16x128xf32>
    %86 = tpu.matmul %84, %85, %cst_11 {dimension_numbers = #tpu.dot_dimension_numbers<[1], [0], [0], [1], [0, 0, 1, 1], [], []>} : vector<16x512xbf16>, vector<512x128xbf16>, vector<16x128xf32> -> vector<16x128xf32>
    %c0_12 = arith.constant 0 : index
    %c0_13 = arith.constant 0 : index
    %87 = vector.load %arg5[%c0_12, %c0_13] : memref<1x128xf32, #tpu.memory_space<vmem>>, vector<1x128xf32>
    %88 = vector.broadcast %87 : vector<1x128xf32> to vector<16x128xf32>
    %89 = arith.addf %86, %88 : vector<16x128xf32>
    %cst_14 = arith.constant 0.000000e+00 : f32
    %90 = vector.broadcast %cst_14 : f32 to vector<16x128xf32>
    %91 = arith.cmpf oge, %89, %90 : vector<16x128xf32>
    %cst_15 = arith.constant 0.00999999977 : f32
    %92 = vector.broadcast %cst_15 : f32 to vector<16x128xf32>
    %93 = arith.mulf %92, %89 : vector<16x128xf32>
    %94 = arith.select %91, %89, %93 : vector<16x128xi1>, vector<16x128xf32>
    %95 = vector.shape_cast %94 : vector<16x128xf32> to vector<1x4x4x128xf32>
    %96 = vector.extract_strided_slice %95 {offsets = [0, 0, 0, 0], sizes = [1, 3, 3, 128], strides = [1, 1, 1, 1]} : vector<1x4x4x128xf32> to vector<1x3x3x128xf32>
    %97 = vector.extract_strided_slice %95 {offsets = [0, 0, 1, 0], sizes = [1, 3, 3, 128], strides = [1, 1, 1, 1]} : vector<1x4x4x128xf32> to vector<1x3x3x128xf32>
    %98 = vector.extract_strided_slice %95 {offsets = [0, 1, 0, 0], sizes = [1, 3, 3, 128], strides = [1, 1, 1, 1]} : vector<1x4x4x128xf32> to vector<1x3x3x128xf32>
    %99 = vector.extract_strided_slice %95 {offsets = [0, 1, 1, 0], sizes = [1, 3, 3, 128], strides = [1, 1, 1, 1]} : vector<1x4x4x128xf32> to vector<1x3x3x128xf32>
    %100 = tpu.concatenate %96, %97, %98, %99 in 3 : vector<1x3x3x128xf32>, vector<1x3x3x128xf32>, vector<1x3x3x128xf32>, vector<1x3x3x128xf32> -> vector<1x3x3x512xf32>
    %101 = vector.shape_cast %100 : vector<1x3x3x512xf32> to vector<9x512xf32>
    %102 = arith.truncf %101 : vector<9x512xf32> to vector<9x512xbf16>
    %c0_16 = arith.constant 0 : index
    %c0_17 = arith.constant 0 : index
    %103 = vector.load %arg6[%c0_16, %c0_17] : memref<512x128xbf16, #tpu.memory_space<vmem>>, vector<512x128xbf16>
    %cst_18 = arith.constant dense<0.000000e+00> : vector<9x128xf32>
    %104 = tpu.matmul %102, %103, %cst_18 {dimension_numbers = #tpu.dot_dimension_numbers<[1], [0], [0], [1], [0, 0, 1, 1], [], []>} : vector<9x512xbf16>, vector<512x128xbf16>, vector<9x128xf32> -> vector<9x128xf32>
    %c0_19 = arith.constant 0 : index
    %c0_20 = arith.constant 0 : index
    %105 = vector.load %arg7[%c0_19, %c0_20] : memref<1x128xf32, #tpu.memory_space<vmem>>, vector<1x128xf32>
    %106 = vector.broadcast %105 : vector<1x128xf32> to vector<9x128xf32>
    %107 = arith.addf %104, %106 : vector<9x128xf32>
    %cst_21 = arith.constant 0.000000e+00 : f32
    %108 = vector.broadcast %cst_21 : f32 to vector<9x128xf32>
    %109 = arith.cmpf oge, %107, %108 : vector<9x128xf32>
    %cst_22 = arith.constant 0.00999999977 : f32
    %110 = vector.broadcast %cst_22 : f32 to vector<9x128xf32>
    %111 = arith.mulf %110, %107 : vector<9x128xf32>
    %112 = arith.select %109, %107, %111 : vector<9x128xi1>, vector<9x128xf32>
    %113 = arith.truncf %112 : vector<9x128xf32> to vector<9x128xbf16>
    %c0_23 = arith.constant 0 : index
    %c0_24 = arith.constant 0 : index
    %114 = vector.load %arg8[%c0_23, %c0_24] : memref<128x128xbf16, #tpu.memory_space<vmem>>, vector<128x128xbf16>
    %cst_25 = arith.constant dense<0.000000e+00> : vector<9x128xf32>
    %115 = tpu.matmul %113, %114, %cst_25 {dimension_numbers = #tpu.dot_dimension_numbers<[1], [0], [0], [1], [0, 0, 1, 1], [], []>} : vector<9x128xbf16>, vector<128x128xbf16>, vector<9x128xf32> -> vector<9x128xf32>
    %c0_26 = arith.constant 0 : index
    %c0_27 = arith.constant 0 : index
    %116 = vector.load %arg9[%c0_26, %c0_27] : memref<1x128xf32, #tpu.memory_space<vmem>>, vector<1x128xf32>
    %117 = vector.broadcast %116 : vector<1x128xf32> to vector<9x128xf32>
    %118 = arith.addf %115, %117 : vector<9x128xf32>
    %cst_28 = arith.constant 0.000000e+00 : f32
    %119 = vector.broadcast %cst_28 : f32 to vector<9x128xf32>
    %120 = arith.cmpf oge, %118, %119 : vector<9x128xf32>
    %cst_29 = arith.constant 0.00999999977 : f32
    %121 = vector.broadcast %cst_29 : f32 to vector<9x128xf32>
    %122 = arith.mulf %121, %118 : vector<9x128xf32>
    %123 = arith.select %120, %118, %122 : vector<9x128xi1>, vector<9x128xf32>
    %124 = vector.shape_cast %123 : vector<9x128xf32> to vector<1x9x128xf32>
    %c0_30 = arith.constant 0 : index
    %c0_31 = arith.constant 0 : index
    %c0_32 = arith.constant 0 : index
    %125 = vector.load %arg10[%c0_30, %c0_31, %c0_32] : memref<1x9x128xf32, #tpu.memory_space<vmem>>, vector<1x9x128xf32>
    tpu.vector_store %arg10[%c0_30, %c0_31, %c0_32], %124 {strides = array<i32>} : memref<1x9x128xf32, #tpu.memory_space<vmem>>, vector<1x9x128xf32>,
    return
  }
  func.func @transform_0(%arg0: i32) -> (i32, i32, i32, i32) {
    %c0_i32 = arith.constant 0 : i32
    %c0_i32_0 = arith.constant 0 : i32
    %c0_i32_1 = arith.constant 0 : i32
    %c0_i32_2 = arith.constant 0 : i32
    return %arg0, %c0_i32, %c0_i32_0, %c0_i32_1 : i32, i32, i32, i32
  }
  func.func @transform_1(%arg0: i32) -> (i32, i32) {
    %c0_i32 = arith.constant 0 : i32
    %c0_i32_0 = arith.constant 0 : i32
    %c0_i32_1 = arith.constant 0 : i32
    return %c0_i32, %c0_i32_0 : i32, i32
  }
  func.func @transform_2(%arg0: i32) -> (i32, i32) {
    %c0_i32 = arith.constant 0 : i32
    %c0_i32_0 = arith.constant 0 : i32
    %c0_i32_1 = arith.constant 0 : i32
    return %c0_i32, %c0_i32_0 : i32, i32
  }
  func.func @transform_3(%arg0: i32) -> (i32, i32) {
    %c0_i32 = arith.constant 0 : i32
    %c0_i32_0 = arith.constant 0 : i32
    %c0_i32_1 = arith.constant 0 : i32
    return %c0_i32, %c0_i32_0 : i32, i32
  }
  func.func @transform_4(%arg0: i32) -> (i32, i32) {
    %c0_i32 = arith.constant 0 : i32
    %c0_i32_0 = arith.constant 0 : i32
    %c0_i32_1 = arith.constant 0 : i32
    return %c0_i32, %c0_i32_0 : i32, i32
  }
  func.func @transform_5(%arg0: i32) -> (i32, i32) {
    %c0_i32 = arith.constant 0 : i32
    %c0_i32_0 = arith.constant 0 : i32
    %c0_i32_1 = arith.constant 0 : i32
    return %c0_i32, %c0_i32_0 : i32, i32
  }
  func.func @transform_6(%arg0: i32) -> (i32, i32) {
    %c0_i32 = arith.constant 0 : i32
    %c0_i32_0 = arith.constant 0 : i32
    %c0_i32_1 = arith.constant 0 : i32
    return %c0_i32, %c0_i32_0 : i32, i32
  }
  func.func @transform_7(%arg0: i32) -> (i32, i32) {
    %c0_i32 = arith.constant 0 : i32
    %c0_i32_0 = arith.constant 0 : i32
    %c0_i32_1 = arith.constant 0 : i32
    return %c0_i32, %c0_i32_0 : i32, i32
  }
  func.func @transform_8(%arg0: i32) -> (i32, i32) {
    %c0_i32 = arith.constant 0 : i32
    %c0_i32_0 = arith.constant 0 : i32
    %c0_i32_1 = arith.constant 0 : i32
    return %c0_i32, %c0_i32_0 : i32, i32
  }
  func.func @transform_9(%arg0: i32) -> (i32, i32, i32) {
    %c0_i32 = arith.constant 0 : i32
    %c0_i32_0 = arith.constant 0 : i32
    %c0_i32_1 = arith.constant 0 : i32
    return %arg0, %c0_i32, %c0_i32_0 : i32, i32, i32
  }
}

</mosaic_0001>

<bundles_post_ra>
// kernel: encoder_forward.1
= control target key start
LH: loop header
LB: loop body
LE: loop exit
PB: predicated region body
PF: predicated region fallthrough
CT: control target
= control target key end

     0   :  { %s3096_s30 = smov 0   ;;  %s4156_s0 = inlined_call_operand.vmem [shape: f32[2,16,16,8], index: 0, kind: input, shape index: {}]   ;;  %s4157_s1 = inlined_call_operand.vmem [shape: bf16[72,128], index: 1, kind: input, shape index: {}]   ;;  %s4158_s2 = inlined_call_operand.vmem [shape: f32[1,128], index: 2, kind: input, shape index: {}]   ;;  %s4159_s3 = inlined_call_operand.vmem [shape: bf16[512,128], index: 3, kind: input, shape index: {}]   ;;  %s4160_s4 = inlined_call_operand.vmem [shape: f32[1,128], index: 4, kind: input, shape index: {}]   ;;  %s4161_s5 = inlined_call_operand.vmem [shape: bf16[512,128], index: 5, kind: input, shape index: {}]   ;;  %s4162_s6 = inlined_call_operand.vmem [shape: f32[1,128], index: 6, kind: input, shape index: {}]   ;;  %s4163_s7 = inlined_call_operand.vmem [shape: bf16[128,128], index: 7, kind: input, shape index: {}]   ;;  %s4164_s8 = inlined_call_operand.vmem [shape: f32[1,128], index: 8, kind: input, shape index: {}]   ;;  %s4165_s9 = inlined_call_operand.vmem [shape: f32[2,9,128], index: 9, kind: output, shape index: {}]  }
   0x1 LB: > { %s2613_s10 = sadd.s32 4294967295, %s3036_s30   ;;  %p2617_p0 = scmp.ge.s32.totalorder %s3036_s30, 1  ;;  %s3036_s30 = sphi %s3096_s30, %s19_s30  }
   0x2   : > { %p287_p1 = scmp.lt.s32.totalorder %s3036_s30, 3 }
   0x4   : > { %p288_p2 = pnand %p2617_p0, %p287_p1 }
   0x5   : > { %p323_p3 = scmp.lt.s32.totalorder (!%p288_p2), %s2613_s10, 1  ;;  %s3038_s15 = smov (!%p288_p2), 8  }
   0x6   : > { %291 = sbr.rel (%p288_p2) target bundleno = 993 (0x3e1), region = 56  ;;  %s3039_s16 = smov (!%p288_p2), 24  }
   0x7   : > { %s3040_s17 = smov (!%p288_p2), 32   ;;  %s3041_s18 = smov (!%p288_p2), 40  }
   0x8   : > { %s3042_s19 = smov (!%p288_p2), 16   ;;  %s3043_s20 = smov (!%p288_p2), 48  }
   0x9   : > { %s3044_s21 = smov (!%p288_p2), 64   ;;  %s3045_s22 = smov (!%p288_p2), 56  }
   0xb   : > { %s4167_s10 = smov (!%p323_p3, %s2613_s10), 1  ;;  %vm604_vm0 = vcmask 1040384   ;;  %vm620_vm1 = vcmask 1041408   ;;  %vm636_vm2 = vcmask 1042432   ;;  %vm652_vm3 = vcmask 1043456  }
   0xc   : > { %s2932_s11 = sshll.u32 %s4167_s10, 8  ;;  %vm668_vm4 = vcmask 1044480   ;;  %vm684_vm5 = vcmask 1045504   ;;  %vm700_vm6 = vcmask 1046528   ;;  %vm1064_vm7 = vcmask 64512  }
   0xd   : > { %s3110_s14 = scalar_lea.vmem %s4156_s0, %s2932_s11  ;;  %vm1072_vm8 = vcmask 130048   ;;  %vm1080_vm9 = vcmask 195584   ;;  %vm1088_vm10 = vcmask 261120   ;;  %vm1096_vm11 = vcmask 326656  }
   0xe   : > { %v3113_v0 = vld [vmem:[%s3110_s14 + $0x20] sm:$0xff]  ;;  %v3116_v1 = vld [vmem:[%s3110_s14 + $0x28] sm:$0xff]  ;;  %v336_v12 = vld [vmem:[%s3110_s14 + $0x10] sm:$0xff]  ;;  %vm1104_vm12 = vcmask 392192   ;;  %vm1112_vm13 = vcmask 457728   ;;  %vm1120_vm14 = vcmask 523264  }
   0xf   : > { %v3119_v2 = vld [vmem:[%s3110_s14] sm:$0xff]  ;;  %v381_v3 = vrot.slane %v3113_v0, 1  ;;  %v411_v4 = vrot.slane %v3113_v0, 2  ;;  %v441_v5 = vrot.slane %v3113_v0, 3  ;;  %v516_v6 = vrot.slane %v3116_v1, 5  ;;  %v3126_v7 = vld [vmem:[%s3110_s14 + $0x8] sm:$0xff] }
  0x10   : > { %v546_v8 = vrot.slane %v3116_v1, 6  ;;  %v576_v9 = vrot.slane %v3116_v1, 7  ;;  %v718_v10 = vrot.slane %v3113_v0, 4  ;;  %v379_v11 = vrot.slane %v3119_v2, 1  ;;  %v3148_v21 = vld [vmem:[%s3110_s14 + $0x18] sm:$0xff]  ;;  %v3158_v30 = vld [vmem:[%s3110_s14 + $0x30] sm:$0xff] }
  0x11   : > { %v748_v13 = vsel %vm604_vm0, %v381_v3, %v411_v4  ;;  %v409_v14 = vrot.slane %v3119_v2, 2  ;;  %v439_v15 = vrot.slane %v3119_v2, 3  ;;  %v484_v16 = vrot.slane %v3126_v7, 4  ;;  %v3175_v39 = vld [vmem:[%s3110_s14 + $0x38] sm:$0xff] }
  0x12   : > { %v763_v17 = vsel %vm620_vm1, %v748_v13, %v441_v5  ;;  %v514_v18 = vrot.slane %v3126_v7, 5  ;;  %v544_v19 = vrot.slane %v3126_v7, 6  ;;  %v574_v20 = vrot.slane %v3126_v7, 7 }
  0x13   : > { %v778_v22 = vsel %vm636_vm2, %v763_v17, %v718_v10  ;;  %v716_v23 = vrot.slane %v3119_v2, 4  ;;  %v746_v24 = vsel %vm604_vm0, %v379_v11, %v409_v14  ;;  %v380_v25 = vrot.slane %v336_v12, 1 }
  0x14   : > { %v793_v26 = vsel %vm652_vm3, %v778_v22, %v516_v6  ;;  %v761_v27 = vsel %vm620_vm1, %v746_v24, %v439_v15  ;;  %v410_v28 = vrot.slane %v336_v12, 2  ;;  %v440_v29 = vrot.slane %v336_v12, 3 }
  0x15   : > { %v808_v31 = vsel %vm668_vm4, %v793_v26, %v546_v8  ;;  %v776_v32 = vsel %vm636_vm2, %v761_v27, %v716_v23  ;;  %v485_v33 = vrot.slane %v3148_v21, 4  ;;  %v515_v34 = vrot.slane %v3148_v21, 5 }
  0x16   : > { %v823_v35 = vsel %vm684_vm5, %v808_v31, %v576_v9  ;;  %v791_v36 = vsel %vm652_vm3, %v776_v32, %v514_v18  ;;  %v545_v37 = vrot.slane %v3148_v21, 6  ;;  %v575_v38 = vrot.slane %v3148_v21, 7 }
  0x17   : > { %v3179_v40 = vsel %vm700_vm6, %v823_v35, %v3116_v1  ;;  %v806_v41 = vsel %vm668_vm4, %v791_v36, %v544_v19  ;;  %v606_v42 = vsel %vm604_vm0, %v336_v12, %v380_v25  ;;  %v382_v43 = vrot.slane %v3158_v30, 1 }
  0x18   : > { %860 = vrot.lane.b32.xlu1 %v3179_v40, %s3038_s15  ;;  %v821_v44 = vsel %vm684_vm5, %v806_v41, %v574_v20  ;;  %v622_v45 = vsel %vm620_vm1, %v606_v42, %v410_v28  ;;  %v412_v46 = vrot.slane %v3158_v30, 2  ;;  %v442_v47 = vrot.slane %v3158_v30, 3 }
  0x19   : > { %v836_v48 = vsel %vm700_vm6, %v821_v44, %v3126_v7  ;;  %v638_v49 = vsel %vm636_vm2, %v622_v45, %v440_v29  ;;  %v487_v50 = vrot.slane %v3175_v39, 4  ;;  %v517_v51 = vrot.slane %v3175_v39, 5 }
  0x1a   : > { %858 = vrot.lane.b32.xlu0 %v836_v48, %s3038_s15  ;;  %v654_v52 = vsel %vm652_vm3, %v638_v49, %v485_v33  ;;  %v547_v53 = vrot.slane %v3175_v39, 6  ;;  %v577_v54 = vrot.slane %v3175_v39, 7  ;;  %v608_v55 = vsel %vm604_vm0, %v3158_v30, %v382_v43  ;;  %v344_v48 = vld [vmem:[%s3110_s14 + $0x50] sm:$0xff] }
  0x1b   : > { %v670_v56 = vsel %vm668_vm4, %v654_v52, %v515_v34  ;;  %v624_v57 = vsel %vm620_vm1, %v608_v55, %v412_v46  ;;  %v717_v58 = vrot.slane %v336_v12, 4  ;;  %v747_v59 = vsel %vm604_vm0, %v380_v25, %v410_v28 }
  0x1c   : > { %v686_v60 = vsel %vm684_vm5, %v670_v56, %v545_v37  ;;  %v640_v61 = vsel %vm636_vm2, %v624_v57, %v442_v47  ;;  %v762_v62 = vsel %vm620_vm1, %v747_v59, %v440_v29  ;;  %v605_v63 = vsel %vm604_vm0, %v3119_v2, %v379_v11  ;;  %v342_v29 = vld [vmem:[%s3110_s14 + $0x40] sm:$0xff] }
  0x1d   : > { %v702_v10 = vsel %vm700_vm6, %v686_v60, %v575_v38  ;;  %v656_v13 = vsel %vm652_vm3, %v640_v61, %v487_v50  ;;  %v777_v17 = vsel %vm636_vm2, %v762_v62, %v717_v58  ;;  %v621_v12 = vsel %vm620_vm1, %v605_v63, %v409_v14  ;;  %v346_v61 = vld [vmem:[%s3110_s14 + $0x60] sm:$0xff]  ;;  %v345_v62 = vld [vmem:[%s3110_s14 + $0x58] sm:$0xff] }
  0x1e   : > { %v672_v22 = vsel %vm668_vm4, %v656_v13, %v517_v51  ;;  %v792_v23 = vsel %vm652_vm3, %v777_v17, %v515_v34  ;;  %v637_v24 = vsel %vm636_vm2, %v621_v12, %v439_v15  ;;  %v719_v11 = vrot.slane %v3158_v30, 4 }
  0x1f   : > { %v688_v25 = vsel %vm684_vm5, %v672_v22, %v547_v53  ;;  %v807_v26 = vsel %vm668_vm4, %v792_v23, %v545_v37  ;;  %v653_v2 = vsel %vm652_vm3, %v637_v24, %v484_v16  ;;  %v749_v15 = vsel %vm604_vm0, %v382_v43, %v412_v46  ;;  %v3268_v43 = vld [vmem:[%s3110_s14 + $0x48] sm:$0xff] }
  0x20   : > { %921 = vrot.lane.b32.xlu1 %v702_v10, %s3039_s16  ;;  %v704_v27 = vsel %vm700_vm6, %v688_v25, %v577_v54  ;;  %v822_v14 = vsel %vm684_vm5, %v807_v26, %v575_v38  ;;  %v669_v28 = vsel %vm668_vm4, %v653_v2, %v514_v18  ;;  %v764_v30 = vsel %vm620_vm1, %v749_v15, %v442_v47 }
  0x21   : > { %v837_v31 = vsel %vm700_vm6, %v822_v14, %v3148_v21  ;;  %v685_v16 = vsel %vm684_vm5, %v669_v28, %v544_v19  ;;  %v779_v32 = vsel %vm636_vm2, %v764_v30, %v719_v11  ;;  %v486_v18 = vrot.slane %v3116_v1, 4  ;;  %v347_v30 = vld [vmem:[%s3110_s14 + $0x68] sm:$0xff] }
  0x22   : > { %923 = vrot.lane.b32.xlu0 %v704_v27, %s3039_s16  ;;  %949 = vrot.lane.b32.xlu2 %v837_v31, %s3040_s17  ;;  %v607_v21 = vsel %vm604_vm0, %v3113_v0, %v381_v3  ;;  %v3249_v19 = vsel %vm700_vm6, %v685_v16, %v574_v20  ;;  %v794_v33 = vsel %vm652_vm3, %v779_v32, %v517_v51  ;;  %v383_v35 = vrot.slane %v342_v29, 1 }
  0x23   : > { %v623_v34 = vsel %vm620_vm1, %v607_v21, %v411_v4  ;;  %v970_v36 = vrot.slane %v702_v10, 1  ;;  %v809_v37 = vsel %vm668_vm4, %v794_v33, %v547_v53  ;;  %v413_v3 = vrot.slane %v342_v29, 2 }
  0x24   : > { %v639_v38 = vsel %vm636_vm2, %v623_v34, %v441_v5  ;;  %v824_v7 = vsel %vm684_vm5, %v809_v37, %v577_v54  ;;  %v886_v41 = vrot.slane %v3249_v19, 1  ;;  %v443_v0 = vrot.slane %v342_v29, 3 }
  0x25   : > { %v655_v20 = vsel %vm652_vm3, %v639_v38, %v486_v18  ;;  %v839_v4 = vsel %vm700_vm6, %v824_v7, %v3175_v39  ;;  %v609_v5 = vsel %vm604_vm0, %v342_v29, %v383_v35  ;;  %v971_v47 = vrot.slane %v704_v27, 1  ;;  %v348_v38 = vld [vmem:[%s3110_s14 + $0x70] sm:$0xff] }
  0x26   : > { %v671_v42 = vsel %vm668_vm4, %v655_v20, %v516_v6  ;;  %v625_v45 = vsel %vm620_vm1, %v609_v5, %v413_v3  ;;  %v488_v6 = vrot.slane %v3268_v43, 4  ;;  %v750_v49 = vsel %vm604_vm0, %v383_v35, %v413_v3 }
  0x27   : > { %v687_v44 = vsel %vm684_vm5, %v671_v42, %v546_v8  ;;  %v641_v46 = vsel %vm636_vm2, %v625_v45, %v443_v0  ;;  %v518_v8 = vrot.slane %v3268_v43, 5  ;;  %v720_v52 = vrot.slane %v342_v29, 4 }
  0x28   : > { %977 = vrot.lane.b32.xlu1 %v970_v36, %s3041_s18  ;;  %v3282_v39 = vsel %vm700_vm6, %v687_v44, %v576_v9  ;;  %v657_v51 = vsel %vm652_vm3, %v641_v46, %v488_v6  ;;  %v384_v53 = vrot.slane %v344_v48, 1  ;;  %v414_v1 = vrot.slane %v344_v48, 2 }
  0x29   : > { %v887_v50 = vrot.slane %v3282_v39, 1  ;;  %v548_v9 = vrot.slane %v3268_v43, 6  ;;  %v765_v54 = vsel %vm620_vm1, %v750_v49, %v443_v0  ;;  %v673_v55 = vsel %vm668_vm4, %v657_v51, %v518_v8  ;;  %v350_v49 = vld [vmem:[%s3110_s14 + $0x80] sm:$0xff]  ;;  %v349_v51 = vld [vmem:[%s3110_s14 + $0x78] sm:$0xff] }
  0x2a   : > { %893 = vrot.lane.b32.xlu0 %v886_v41, %s3042_s19  ;;  %951 = vrot.lane.b32.xlu2 %v839_v4, %s3040_s17  ;;  %v444_v56 = vrot.slane %v344_v48, 3  ;;  %v578_v57 = vrot.slane %v3268_v43, 7  ;;  %v780_v58 = vsel %vm636_vm2, %v765_v54, %v720_v52  ;;  %v751_v59 = vsel %vm604_vm0, %v384_v53, %v414_v1 }
  0x2b   : > { %v689_v60 = vsel %vm684_vm5, %v673_v55, %v548_v9  ;;  %v610_v63 = vsel %vm604_vm0, %v344_v48, %v384_v53  ;;  %v721_v10 = vrot.slane %v344_v48, 4  ;;  %v795_v13 = vsel %vm652_vm3, %v780_v58, %v518_v8 }
  0x2c   : > { %v766_v17 = vsel %vm620_vm1, %v751_v59, %v444_v56  ;;  %v3307_v12 = vsel %vm700_vm6, %v689_v60, %v578_v57  ;;  %v385_v22 = vrot.slane %v346_v61, 1  ;;  %v415_v23 = vrot.slane %v346_v61, 2 }
  0x2d   : > { %v519_v24 = vrot.slane %v345_v62, 5  ;;  %v626_v25 = vsel %vm620_vm1, %v610_v63, %v414_v1  ;;  %v810_v26 = vsel %vm668_vm4, %v795_v13, %v548_v9  ;;  %v781_v2 = vsel %vm636_vm2, %v766_v17, %v721_v10 }
  0x2e   : > { %v489_v11 = vrot.slane %v345_v62, 4  ;;  %v445_v27 = vrot.slane %v346_v61, 3  ;;  %v549_v14 = vrot.slane %v345_v62, 6  ;;  %v642_v28 = vsel %vm636_vm2, %v626_v25, %v444_v56 }
  0x2f   : > { %v752_v15 = vsel %vm604_vm0, %v385_v22, %v415_v23  ;;  %v888_v29 = vrot.slane %v3307_v12, 1  ;;  %v825_v31 = vsel %vm684_vm5, %v810_v26, %v578_v57  ;;  %v796_v16 = vsel %vm652_vm3, %v781_v2, %v519_v24 }
  0x30   : > { %979 = vrot.lane.b32.xlu1 %v971_v47, %s3041_s18  ;;  %v611_v32 = vsel %vm604_vm0, %v346_v61, %v385_v22  ;;  %v722_v18 = vrot.slane %v346_v61, 4  ;;  %v579_v21 = vrot.slane %v345_v62, 7  ;;  %v767_v33 = vsel %vm620_vm1, %v752_v15, %v445_v27  ;;  %v351_v22 = vld [vmem:[%s3110_s14 + $0x88] sm:$0xff] }
  0x31   : > { %v840_v34 = vsel %vm700_vm6, %v825_v31, %v3268_v43  ;;  %v811_v35 = vsel %vm668_vm4, %v796_v16, %v549_v14  ;;  %v520_v36 = vrot.slane %v347_v30, 5  ;;  %v627_v37 = vsel %vm620_vm1, %v611_v32, %v415_v23 }
  0x32   : > { %999 = vrot.lane.b32.xlu0 %v3282_v39, %s3043_s20  ;;  %895 = vrot.lane.b32.xlu2 %v887_v50, %s3042_s19  ;;  %v782_v7 = vsel %vm636_vm2, %v767_v33, %v722_v18  ;;  %v826_v20 = vsel %vm684_vm5, %v811_v35, %v579_v21  ;;  %v490_v41 = vrot.slane %v347_v30, 4  ;;  %v550_v42 = vrot.slane %v347_v30, 6 }
  0x33   : > { %v643_v4 = vsel %vm636_vm2, %v627_v37, %v445_v27  ;;  %v386_v43 = vrot.slane %v348_v38, 1  ;;  %v797_v5 = vsel %vm652_vm3, %v782_v7, %v520_v36  ;;  %v841_v44 = vsel %vm700_vm6, %v826_v20, %v345_v62 }
  0x34   : > { %v580_v45 = vrot.slane %v347_v30, 7  ;;  %v659_v6 = vsel %vm652_vm3, %v643_v4, %v490_v41  ;;  %v416_v46 = vrot.slane %v348_v38, 2  ;;  %v812_v48 = vsel %vm668_vm4, %v797_v5, %v550_v42  ;;  %v354_v41 = vld [vmem:[%s3110_s14 + $0xa0] sm:$0xff]  ;;  %v3395_v4 = vld [vmem:[%s3110_s14 + $0x98] sm:$0xff] }
  0x35   : > { %v612_v8 = vsel %vm604_vm0, %v348_v38, %v386_v43  ;;  %v446_v52 = vrot.slane %v348_v38, 3  ;;  %v387_v9 = vrot.slane %v350_v49, 1  ;;  %v491_v55 = vrot.slane %v349_v51, 4 }
  0x36   : > { %v827_v53 = vsel %vm684_vm5, %v812_v48, %v580_v45  ;;  %v628_v1 = vsel %vm620_vm1, %v612_v8, %v416_v46  ;;  %v753_v57 = vsel %vm604_vm0, %v386_v43, %v416_v46  ;;  %v417_v60 = vrot.slane %v350_v49, 2 }
  0x37   : > { %v842_v56 = vsel %vm700_vm6, %v827_v53, %v347_v30  ;;  %v644_v58 = vsel %vm636_vm2, %v628_v1, %v446_v52  ;;  %v521_v62 = vrot.slane %v349_v51, 5  ;;  %v723_v63 = vrot.slane %v348_v38, 4 }
  0x38   : > { %1043 = vrot.lane.b32.xlu1 %v887_v50, %s3044_s21  ;;  %v675_v50 = vsel %vm668_vm4, %v659_v6, %v520_v36  ;;  %v613_v10 = vsel %vm604_vm0, %v350_v49, %v387_v9  ;;  %v768_v13 = vsel %vm620_vm1, %v753_v57, %v446_v52  ;;  %v660_v17 = vsel %vm652_vm3, %v644_v58, %v491_v55 }
  0x39   : > { %v691_v54 = vsel %vm684_vm5, %v675_v50, %v550_v42  ;;  %v447_v23 = vrot.slane %v350_v49, 3  ;;  %v629_v25 = vsel %vm620_vm1, %v613_v10, %v417_v60  ;;  %v783_v26 = vsel %vm636_vm2, %v768_v13, %v723_v63 }
  0x3a   : > { %1001 = vrot.lane.b32.xlu0 %v3307_v12, %s3043_s20  ;;  %1021 = vrot.lane.b32.xlu2 %v3179_v40, %s3045_s22  ;;  %v658_v40 = vsel %vm652_vm3, %v642_v28, %v489_v11  ;;  %v3358_v61 = vsel %vm700_vm6, %v691_v54, %v580_v45  ;;  %v676_v2 = vsel %vm668_vm4, %v660_v17, %v521_v62  ;;  %v492_v27 = vrot.slane %v351_v22, 4 }
  0x3b   : > { %v674_v3 = vsel %vm668_vm4, %v658_v40, %v519_v24  ;;  %v551_v24 = vrot.slane %v349_v51, 6  ;;  %v889_v11 = vrot.slane %v3358_v61, 1  ;;  %v581_v28 = vrot.slane %v349_v51, 7 }
  0x3c   : > { %v690_v0 = vsel %vm684_vm5, %v674_v3, %v549_v14  ;;  %v3373_v14 = vld [vmem:[%s3110_s14 + $0x90] sm:$0xff]  ;;  %v754_v15 = vsel %vm604_vm0, %v387_v9, %v417_v60  ;;  %v798_v31 = vsel %vm652_vm3, %v783_v26, %v521_v62  ;;  %v522_v30 = vrot.slane %v351_v22, 5  ;;  %v3417_v9 = vld [vmem:[%s3110_s14 + $0xa8] sm:$0xff] }
  0x3d   : > { %v706_v47 = vsel %vm700_vm6, %v690_v0, %v579_v21  ;;  %v692_v16 = vsel %vm684_vm5, %v676_v2, %v551_v24  ;;  %v724_v32 = vrot.slane %v350_v49, 4  ;;  %v388_v18 = vrot.slane %v3373_v14, 1  ;;  %v356_v26 = vld [vmem:[%s3110_s14 + $0xb0] sm:$0xff] }
  0x3e   : > { %v972_v59 = vrot.slane %v706_v47, 1  ;;  %v769_v21 = vsel %vm620_vm1, %v754_v15, %v447_v23  ;;  %v813_v33 = vsel %vm668_vm4, %v798_v31, %v551_v24  ;;  %v552_v35 = vrot.slane %v351_v22, 6 }
  0x3f   : > { %v418_v36 = vrot.slane %v3373_v14, 2  ;;  %v784_v37 = vsel %vm636_vm2, %v769_v21, %v724_v32  ;;  %v614_v3 = vsel %vm604_vm0, %v3373_v14, %v388_v18  ;;  %v828_v7 = vsel %vm684_vm5, %v813_v33, %v581_v28 }
  0x40   : > { %897 = vrot.lane.b32.xlu1 %v888_v29, %s3042_s19  ;;  %v582_v42 = vrot.slane %v351_v22, 7  ;;  %v448_v43 = vrot.slane %v3373_v14, 3  ;;  %v799_v0 = vsel %vm652_vm3, %v784_v37, %v522_v30  ;;  %v843_v45 = vsel %vm700_vm6, %v828_v7, %v349_v51  ;;  %v357_v37 = vld [vmem:[%s3110_s14 + $0xb8] sm:$0xff] }
  0x41   : > { %v389_v6 = vrot.slane %v354_v41, 1  ;;  %v493_v46 = vrot.slane %v3395_v4, 4  ;;  %v419_v49 = vrot.slane %v354_v41, 2  ;;  %v523_v50 = vrot.slane %v3395_v4, 5 }
  0x42   : > { %1023 = vrot.lane.b32.xlu0 %v840_v34, %s3045_s22  ;;  %862 = vrot.lane.b32.xlu2 %v840_v34, %s3038_s15  ;;  %v708_v34 = vsel %vm700_vm6, %v692_v16, %v581_v28  ;;  %v449_v54 = vrot.slane %v354_v41, 3  ;;  %v553_v55 = vrot.slane %v3395_v4, 6  ;;  %v755_v57 = vsel %vm604_vm0, %v388_v18, %v418_v36 }
  0x43   : > { %v973_v20 = vrot.slane %v708_v34, 1  ;;  %v615_v51 = vsel %vm604_vm0, %v354_v41, %v389_v6  ;;  %v725_v60 = vrot.slane %v3373_v14, 4  ;;  %v494_v62 = vrot.slane %v3417_v9, 4 }
  0x44   : > { %v770_v63 = vsel %vm620_vm1, %v755_v57, %v448_v43  ;;  %v583_v10 = vrot.slane %v3395_v4, 7  ;;  %v420_v31 = vrot.slane %v356_v26, 2  ;;  %v584_v16 = vrot.slane %v3417_v9, 7 }
  0x45   : > { %v785_v24 = vsel %vm636_vm2, %v770_v63, %v725_v60  ;;  %v450_v21 = vrot.slane %v356_v26, 3  ;;  %v360_v63 = vld [vmem:[%s3110_s14 + $0xd0] sm:$0xff]  ;;  %vm1291_vm15 = vcmask 588800  }
  0x46   : > { %v800_v28 = vsel %vm652_vm3, %v785_v24, %v523_v50  ;;  %v392_v24 = vrot.slane %v360_v63, 1 }
  0x47   : > { %v815_v32 = vsel %vm668_vm4, %v800_v28, %v553_v55  ;;  %v422_v28 = vrot.slane %v360_v63, 2 }
  0x48   : > { %953 = vrot.lane.b32.xlu1 %v841_v44, %s3040_s17  ;;  %v630_v44 = vsel %vm620_vm1, %v614_v3, %v418_v36  ;;  %v727_v3 = vrot.slane %v356_v26, 4 }
  0x49   : > { %v646_v8 = vsel %vm636_vm2, %v630_v44, %v448_v43 }
  0x4a   : > { %925 = vrot.lane.b32.xlu0 %v706_v47, %s3039_s16  ;;  %1045 = vrot.lane.b32.xlu2 %v888_v29, %s3044_s21  ;;  %v645_v29 = vsel %vm636_vm2, %v629_v25, %v447_v23  ;;  %v814_v47 = vsel %vm668_vm4, %v799_v0, %v552_v35  ;;  %v662_v1 = vsel %vm652_vm3, %v646_v8, %v493_v46  ;;  %v495_v46 = vrot.slane %v357_v37, 4 }
  0x4b   : > { %v661_v40 = vsel %vm652_vm3, %v645_v29, %v492_v27  ;;  %v829_v52 = vsel %vm684_vm5, %v814_v47, %v582_v42  ;;  %v756_v23 = vsel %vm604_vm0, %v389_v6, %v419_v49  ;;  %v554_v27 = vrot.slane %v3417_v9, 6 }
  0x4c   : > { %v677_v38 = vsel %vm668_vm4, %v661_v40, %v522_v30  ;;  %v844_v58 = vsel %vm700_vm6, %v829_v52, %v351_v22  ;;  %v524_v22 = vrot.slane %v3417_v9, 5  ;;  %v771_v14 = vsel %vm620_vm1, %v756_v23, %v449_v54 }
  0x4d   : > { %v693_v5 = vsel %vm684_vm5, %v677_v38, %v552_v35  ;;  %v390_v29 = vrot.slane %v356_v26, 1  ;;  %v358_v35 = vld [vmem:[%s3110_s14 + $0xc0] sm:$0xff] }
  0x4e   : > { %v3406_v48 = vsel %vm700_vm6, %v693_v5, %v582_v42  ;;  %v391_v43 = vrot.slane %v358_v35, 1  ;;  %v421_v0 = vrot.slane %v358_v35, 2  ;;  %v525_v5 = vrot.slane %v357_v37, 5 }
  0x4f   : > { %v890_v53 = vrot.slane %v3406_v48, 1  ;;  %v757_v40 = vsel %vm604_vm0, %v390_v29, %v420_v31  ;;  %v616_v38 = vsel %vm604_vm0, %v356_v26, %v390_v29  ;;  %v451_v47 = vrot.slane %v358_v35, 3 }
  0x50   : > { %1025 = vrot.lane.b32.xlu1 %v842_v56, %s3045_s22  ;;  %v632_v44 = vsel %vm620_vm1, %v616_v38, %v420_v31  ;;  %v618_v31 = vsel %vm604_vm0, %v360_v63, %v392_v24 }
  0x51   : > { %v648_v8 = vsel %vm636_vm2, %v632_v44, %v450_v21  ;;  %v729_v44 = vrot.slane %v360_v63, 4 }
  0x52   : > { %1003 = vrot.lane.b32.xlu0 %v3358_v61, %s3043_s20  ;;  %981 = vrot.lane.b32.xlu2 %v972_v59, %s3041_s18  ;;  %v678_v59 = vsel %vm668_vm4, %v662_v1, %v523_v50  ;;  %v617_v1 = vsel %vm604_vm0, %v358_v35, %v391_v43  ;;  %v664_v57 = vsel %vm652_vm3, %v648_v8, %v495_v46 }
  0x53   : > { %v694_v17 = vsel %vm684_vm5, %v678_v59, %v553_v55 }
  0x54   : > { %v710_v2 = vsel %vm700_vm6, %v694_v17, %v583_v10 }
  0x55   : > { %v974_v7 = vrot.slane %v710_v2, 1 }
  0x58   : > { %899 = vrot.lane.b32.xlu1 %v889_v11, %s3042_s19 }
  0x5a   : > { %864 = vrot.lane.b32.xlu0 %v842_v56, %s3038_s15  ;;  %1047 = vrot.lane.b32.xlu2 %v889_v11, %s3044_s21  ;;  %v631_v56 = vsel %vm620_vm1, %v615_v51, %v419_v49  ;;  %v726_v11 = vrot.slane %v354_v41, 4  ;;  %v758_v49 = vsel %vm604_vm0, %v391_v43, %v421_v0 }
  0x5b   : > { %v647_v13 = vsel %vm636_vm2, %v631_v56, %v449_v54  ;;  %v728_v54 = vrot.slane %v358_v35, 4  ;;  %v585_v56 = vrot.slane %v357_v37, 7 }
  0x5c   : > { %v663_v25 = vsel %vm652_vm3, %v647_v13, %v494_v62  ;;  %v786_v30 = vsel %vm636_vm2, %v771_v14, %v726_v11  ;;  %v633_v62 = vsel %vm620_vm1, %v617_v1, %v421_v0 }
  0x5d   : > { %v679_v15 = vsel %vm668_vm4, %v663_v25, %v524_v22  ;;  %v801_v33 = vsel %vm652_vm3, %v786_v30, %v524_v22  ;;  %v649_v23 = vsel %vm636_vm2, %v633_v62, %v451_v47 }
  0x5e   : > { %v695_v18 = vsel %vm684_vm5, %v679_v15, %v554_v27  ;;  %v816_v41 = vsel %vm668_vm4, %v801_v33, %v554_v27  ;;  %v634_v33 = vsel %vm620_vm1, %v618_v31, %v422_v28 }
  0x5f   : > { %v3456_v36 = vsel %vm700_vm6, %v695_v18, %v584_v16  ;;  %v831_v6 = vsel %vm684_vm5, %v816_v41, %v584_v16  ;;  %v362_v16 = vld [vmem:[%s3110_s14 + $0xe0] sm:$0xff]  ;;  %v452_v18 = vrot.slane %v360_v63, 3 }
  0x60   : > { %983 = vrot.lane.b32.xlu1 %v973_v20, %s3041_s18  ;;  %v772_v20 = vsel %vm620_vm1, %v757_v40, %v450_v21  ;;  %v846_v52 = vsel %vm700_vm6, %v831_v6, %v3417_v9  ;;  %v891_v55 = vrot.slane %v3456_v36, 1  ;;  %v680_v9 = vsel %vm668_vm4, %v664_v57, %v525_v5 }
  0x61   : > { %v650_v41 = vsel %vm636_vm2, %v634_v33, %v452_v18  ;;  %v423_v43 = vrot.slane %v362_v16, 2 }
  0x62   : > { %955 = vrot.lane.b32.xlu0 %v843_v45, %s3040_s17  ;;  %927 = vrot.lane.b32.xlu2 %v708_v34, %s3039_s16  ;;  %v830_v34 = vsel %vm684_vm5, %v815_v32, %v583_v10  ;;  %v787_v45 = vsel %vm636_vm2, %v772_v20, %v727_v3  ;;  %v3506_v32 = vld [vmem:[%s3110_s14 + $0xd8] sm:$0xff]  ;;  %v759_v20 = vsel %vm604_vm0, %v392_v24, %v422_v28 }
  0x63   : > { %v845_v42 = vsel %vm700_vm6, %v830_v34, %v3395_v4  ;;  %v555_v4 = vrot.slane %v357_v37, 6  ;;  %v802_v51 = vsel %vm652_vm3, %v787_v45, %v525_v5  ;;  %v393_v34 = vrot.slane %v362_v16, 1 }
  0x64   : > { %v497_v3 = vrot.slane %v3506_v32, 4  ;;  %v527_v5 = vrot.slane %v3506_v32, 5  ;;  %v774_v6 = vsel %vm620_vm1, %v759_v20, %v452_v18  ;;  %v587_v57 = vrot.slane %v3506_v32, 7 }
  0x65   : > { %v817_v59 = vsel %vm668_vm4, %v802_v51, %v555_v4  ;;  %v696_v26 = vsel %vm684_vm5, %v680_v9, %v555_v4  ;;  %v619_v45 = vsel %vm604_vm0, %v362_v16, %v393_v34  ;;  %v453_v4 = vrot.slane %v362_v16, 3 }
  0x66   : > { %v832_v13 = vsel %vm684_vm5, %v817_v59, %v585_v56  ;;  %v712_v15 = vsel %vm700_vm6, %v696_v26, %v585_v56  ;;  %v666_v46 = vsel %vm652_vm3, %v650_v41, %v497_v3  ;;  %v635_v51 = vsel %vm620_vm1, %v619_v45, %v423_v43 }
  0x67   : > { %v847_v11 = vsel %vm700_vm6, %v832_v13, %v357_v37  ;;  %v651_v59 = vsel %vm636_vm2, %v635_v51, %v453_v4  ;;  %v730_v9 = vrot.slane %v362_v16, 4 }
  0x68   : > { %1049 = vrot.lane.b32.xlu1 %v890_v53, %s3044_s21 }
  0x6a   : > { %1027 = vrot.lane.b32.xlu0 %v844_v58, %s3045_s22  ;;  %1005 = vrot.lane.b32.xlu2 %v3406_v48, %s3043_s20 }
  0x70   : > { %929 = vrot.lane.b32.xlu1 %v710_v2, %s3039_s16 }
  0x72   : > { %901 = vrot.lane.b32.xlu0 %v890_v53, %s3042_s19  ;;  %866 = vrot.lane.b32.xlu2 %v844_v58, %s3038_s15  ;;  %v359_v53 = vld [vmem:[%s3110_s14 + $0xc8] sm:$0xff]  ;;  %v773_v58 = vsel %vm620_vm1, %v758_v49, %v451_v47  ;;  %v557_v49 = vrot.slane %v3506_v32, 6 }
  0x73   : > { %v526_v60 = vrot.slane %v359_v53, 5  ;;  %v788_v10 = vsel %vm636_vm2, %v773_v58, %v728_v54  ;;  %v496_v17 = vrot.slane %v359_v53, 4  ;;  %v556_v22 = vrot.slane %v359_v53, 6  ;;  %v3530_v47 = vld [vmem:[%s3110_s14 + $0xe8] sm:$0xff]  ;;  %s2933_s14 = sshll.u32 %s4167_s10, 4 }
  0x74   : > { %v586_v27 = vrot.slane %v359_v53, 7  ;;  %v498_v56 = vrot.slane %v3530_v47, 4  ;;  %v760_v58 = vsel %vm604_vm0, %v393_v34, %v423_v43  ;;  %v528_v63 = vrot.slane %v3530_v47, 5 }
  0x75   : > { %v803_v2 = vsel %vm652_vm3, %v788_v10, %v526_v60  ;;  %v665_v14 = vsel %vm652_vm3, %v649_v23, %v496_v17  ;;  %v775_v10 = vsel %vm620_vm1, %v760_v58, %v453_v4  ;;  %v558_v24 = vrot.slane %v3530_v47, 6  ;;  %v2935_v58 = vld [vmem:[%s4157_s1 + $0x8] sm:$0xff] }
  0x76   : > { %v818_v29 = vsel %vm668_vm4, %v803_v2, %v556_v22  ;;  %v681_v30 = vsel %vm668_vm4, %v665_v14, %v526_v60  ;;  %v667_v13 = vsel %vm652_vm3, %v651_v59, %v498_v56  ;;  %v790_v26 = vsel %vm636_vm2, %v775_v10, %v730_v9  ;;  %v2934_v9 = vld [vmem:[%s4157_s1] sm:$0xff] }
  0x77   : > { %v833_v40 = vsel %vm684_vm5, %v818_v29, %v586_v27  ;;  %v697_v38 = vsel %vm684_vm5, %v681_v30, %v556_v22  ;;  %v683_v2 = vsel %vm668_vm4, %v667_v13, %v528_v63  ;;  %v588_v31 = vrot.slane %v3530_v47, 7 }
  0x78   : > { %1007 = vrot.lane.b32.xlu1 %v3456_v36, %s3043_s20  ;;  %v3522_v0 = vsel %vm700_vm6, %v697_v38, %v586_v27  ;;  %v805_v16 = vsel %vm652_vm3, %v790_v26, %v528_v63  ;;  %v699_v30 = vsel %vm684_vm5, %v683_v2, %v558_v24 }
  0x79   : > { %v892_v54 = vrot.slane %v3522_v0, 1  ;;  %v820_v33 = vsel %vm668_vm4, %v805_v16, %v558_v24  ;;  %v715_v34 = vsel %vm700_vm6, %v699_v30, %v588_v31 }
  0x7a   : > { %985 = vrot.lane.b32.xlu0 %v974_v7, %s3041_s18  ;;  %957 = vrot.lane.b32.xlu2 %v845_v42, %s3040_s17  ;;  %v848_v7 = vsel %vm700_vm6, %v833_v40, %v359_v53  ;;  %v975_v42 = vrot.slane %v712_v15, 1  ;;  %v682_v53 = vsel %vm668_vm4, %v666_v46, %v527_v5  ;;  %v1259_v40 = vld [vmem:[%s4157_s1 + $0x20] sm:$0xf]  ;;  %v835_v20 = vsel %vm684_vm5, %v820_v33, %v588_v31 }
  0x7b   : > { %v698_v62 = vsel %vm684_vm5, %v682_v53, %v557_v49  ;;  %v1042_v41 = vrot.slane %v715_v34, 1  ;;  %v850_v45 = vsel %vm700_vm6, %v835_v20, %v3530_v47 }
  0x7c   : > { %v3473_v50 = vpop.permute.xlu2 %949  ;;  %v714_v22 = vsel %vm700_vm6, %v698_v62, %v587_v57 }
  0x7d   : > { %v976_v28 = vrot.slane %v714_v22, 1 }
  0x80   : > { %868 = vrot.lane.b32.xlu1 %v846_v52, %s3038_s15 }
  0x82   : > { %1051 = vrot.lane.b32.xlu0 %v891_v55, %s3044_s21  ;;  %1029 = vrot.lane.b32.xlu2 %v846_v52, %s3045_s22  ;;  %v789_v52 = vsel %vm636_vm2, %v774_v6, %v729_v44 }
  0x83   : > { %v804_v60 = vsel %vm652_vm3, %v789_v52, %v527_v5 }
  0x84   : > { %v3493_v25 = vpop.permute.xlu2 %951  ;;  %v819_v17 = vsel %vm668_vm4, %v804_v60, %v557_v49 }
  0x85   : > { %v834_v14 = vsel %vm684_vm5, %v819_v17, %v587_v57 }
  0x86   : > { %v849_v18 = vsel %vm700_vm6, %v834_v14, %v3506_v32 }
  0x88   : > { %959 = vrot.lane.b32.xlu1 %v847_v11, %s3040_s17 }
  0x8a   : > { %931 = vrot.lane.b32.xlu0 %v712_v15, %s3039_s16  ;;  %v3509_v21 = vpop.permute.xlu1 %860  ;;  %903 = vrot.lane.b32.xlu2 %v891_v55, %s3042_s19 }
  0x8b   : > { %v1066_v4 = vsel %vm1064_vm7, %v3282_v39, %v3509_v21 }
  0x8c   : > { %v859_v35 = vpop.permute.xlu0 %858  ;;  %v3514_v37 = vpop.permute.xlu2 %895 }
  0x8d   : > { %v1065_v11 = vsel %vm1064_vm7, %v3249_v19, %v859_v35  ;;  %v1281_v35 = vunpack.c.l.b16 %v1259_v40  ;;  %v1074_v56 = vsel %vm1072_vm8, %v1066_v4, %v3514_v37 }
  0x8f   : > { %v1286_v3 = vpack.c.b16 %v1281_v35, %v1281_v35 }
  0x90   : > { %1031 = vrot.lane.b32.xlu1 %v848_v7, %s3045_s22 }
  0x91   : > { %v1305_v43 = vsel %vm652_vm3, %v1286_v3, 0 }
  0x92   : > { %1009 = vrot.lane.b32.xlu0 %v3522_v0, %s3043_s20  ;;  %v922_v8 = vpop.permute.xlu1 %921  ;;  %987 = vrot.lane.b32.xlu2 %v975_v42, %s3041_s18 }
  0x93   : > { %1310 = vmatpush.bf16.msra.mxu0 %v1305_v43 }
  0x94   : > { %v3539_v1 = vpop.permute.xlu0 %923  ;;  %v1022_v55 = vpop.permute.xlu2 %1021 }
  0x95   : > { %v1082_v39 = vsel %vm1080_vm9, %v1074_v56, %v3539_v1 }
  0x96   : > { %v1090_v59 = vsel %vm1088_vm10, %v1082_v39, %v3493_v25 }
  0x98   : > { %905 = vrot.lane.b32.xlu1 %v892_v54, %s3042_s19 }
  0x9a   : > { %870 = vrot.lane.b32.xlu0 %v848_v7, %s3038_s15  ;;  %v978_v23 = vpop.permute.xlu1 %977  ;;  %1053 = vrot.lane.b32.xlu2 %v892_v54, %s3044_s21 }
  0x9c   : > { %v894_v27 = vpop.permute.xlu0 %893  ;;  %v3562_v15 = vpop.permute.xlu2 %862 }
  0x9d   : > { %v1073_v29 = vsel %vm1072_vm8, %v1065_v11, %v894_v27  ;;  %v1067_v25 = vsel %vm1064_vm7, %v3307_v12, %v3562_v15 }
  0x9e   : > { %v1081_v19 = vsel %vm1080_vm9, %v1073_v29, %v922_v8 }
  0x9f   : > { %v1089_v32 = vsel %vm1088_vm10, %v1081_v19, %v3473_v50  ;;  %v2937_v50 = vld [vmem:[%s4157_s1 + $0x18] sm:$0xff] }
  0xa0   : > { %989 = vrot.lane.b32.xlu1 %v976_v28, %s3041_s18  ;;  %v1097_v5 = vsel %vm1096_vm11, %v1089_v32, %v978_v23  ;;  %1311 = vmatpush.bf16.msra.mxu0 %v2937_v50 }
  0xa2   : > { %961 = vrot.lane.b32.xlu0 %v849_v18, %s3040_s17  ;;  %v980_v38 = vpop.permute.xlu1 %979  ;;  %933 = vrot.lane.b32.xlu2 %v714_v22, %s3039_s16  ;;  %s332_s17 = scalar_lea.vmem %s4165_s9, %s2933_s14 }
  0xa3   : > { %v1098_v37 = vsel %vm1096_vm11, %v1090_v59, %v980_v38 }
  0xa4   : > { %v1000_v7 = vpop.permute.xlu0 %999  ;;  %v1046_v42 = vpop.permute.xlu2 %1045 }
  0xa5   : > { %v1105_v44 = vsel %vm1104_vm12, %v1097_v5, %v1000_v7 }
  0xa6   : > { %v1113_v6 = vsel %vm1112_vm13, %v1105_v44, %v1022_v55  ;;  %v2936_v55 = vld [vmem:[%s4157_s1 + $0x10] sm:$0xff] }
  0xa7   : > { %1312 = vmatpush.bf16.msra.mxu0 %v2936_v55 }
  0xa8   : > { %1055 = vrot.lane.b32.xlu1 %v1042_v41, %s3044_s21 }
  0xaa   : > { %1033 = vrot.lane.b32.xlu0 %v850_v45, %s3045_s22  ;;  %v1044_v46 = vpop.permute.xlu1 %1043  ;;  %1011 = vrot.lane.b32.xlu2 %v715_v34, %s3043_s20 }
  0xab   : > { %v1121_v47 = vsel %vm1120_vm14, %v1113_v6, %v1044_v46  ;;  %1313 = vmatpush.bf16.msra.mxu0 %v2935_v58 }
  0xac   : > { %v1135_v8 = vrot.slane %v1121_v47, 1  ;;  %v1136_v49 = vrot.slane %v1121_v47, 2  ;;  %v1137_v51 = vrot.slane %v1121_v47, 3  ;;  %1177 = vst [vmem:[#allocation1] ss:$9 sm:$0xff] %v1121_v47  ;;  %v1002_v52 = vpop.permute.xlu0 %1001  ;;  %v982_v53 = vpop.permute.xlu2 %981  ;;  %v1138_v54 = vrot.slane %v1121_v47, 4 }
  0xad   : > { %v1139_v57 = vrot.slane %v1121_v47, 5  ;;  %v1140_v21 = vrot.slane %v1121_v47, 6  ;;  %v1106_v1 = vsel %vm1104_vm12, %v1098_v37, %v1002_v52 }
  0xae   : > { %1179 = vst [vmem:[#allocation1 + $0x1] ss:$9 sm:$0xff] %v1135_v8 }
  0xaf   : > { %1181 = vst [vmem:[#allocation1 + $0x2] ss:$9 sm:$0xff] %v1136_v49  ;;  %1314 = vmatpush.bf16.msra.mxu0 %v2934_v9 }
  0xb0   : > { %1183 = vst [vmem:[#allocation1 + $0x3] ss:$9 sm:$0xff] %v1137_v51 }
  0xb1   : > { %1185 = vst [vmem:[#allocation1 + $0x4] ss:$9 sm:$0xff] %v1138_v54 }
  0xb2   : > { %1187 = vst [vmem:[#allocation1 + $0x5] ss:$9 sm:$0xff] %v1139_v57  ;;  %v898_v60 = vpop.permute.xlu1 %897 }
  0xb3   : > { %1189 = vst [vmem:[#allocation1 + $0x6] ss:$9 sm:$0xff] %v1140_v21  ;;  %v1075_v23 = vsel %vm1072_vm8, %v1067_v25, %v898_v60 }
  0xb4   : > { %v1024_v62 = vpop.permute.xlu0 %1023  ;;  %v1048_v63 = vpop.permute.xlu2 %1047 }
  0xb5   : > { %v1114_v10 = vsel %vm1112_vm13, %v1106_v1, %v1024_v62 }
  0xb6   : > { %v1122_v13 = vsel %vm1120_vm14, %v1114_v10, %v1046_v42 }
  0xb7   : > { %1191 = vst [vmem:[#allocation1 + $0x7] ss:$9 sm:$0xff] %v1122_v13  ;;  %v1141_v24 = vrot.slane %v1122_v13, 1  ;;  %v1142_v26 = vrot.slane %v1122_v13, 2  ;;  %v1143_v14 = vrot.slane %v1122_v13, 3  ;;  %v1144_v28 = vrot.slane %v1122_v13, 4 }
  0xb8   : > { %v1145_v29 = vrot.slane %v1122_v13, 5  ;;  %v1146_v16 = vrot.slane %v1122_v13, 6 }
  0xba   : > { %v954_v17 = vpop.permute.xlu1 %953 }
  0xbc   : > { %v926_v22 = vpop.permute.xlu0 %925  ;;  %v928_v27 = vpop.permute.xlu2 %927 }
  0xbd   : > { %v1083_v11 = vsel %vm1080_vm9, %v1075_v23, %v926_v22 }
  0xbe   : > { %v1192_v2 = vld [vmem:[#allocation1] sm:$0xff]  ;;  %v1091_v31 = vsel %vm1088_vm10, %v1083_v11, %v954_v17 }
  0xbf   : > { %1193 = vst [vmem:[#allocation1] ss:$9 sm:$0xff] %v1141_v24  ;;  %v1099_v15 = vsel %vm1096_vm11, %v1091_v31, %v982_v53 }
  0xc0   : > { %1194 = vst [vmem:[#allocation1 + $0x1] ss:$9 sm:$0xff] %v1142_v26 }
  0xc1   : > { %1195 = vst [vmem:[#allocation1 + $0x2] ss:$9 sm:$0xff] %v1143_v14 }
  0xc2   : > { %1196 = vst [vmem:[#allocation1 + $0x3] ss:$9 sm:$0xff] %v1144_v28  ;;  %v1026_v12 = vpop.permute.xlu1 %1025 }
  0xc3   : > { %1197 = vst [vmem:[#allocation1 + $0x4] ss:$9 sm:$0xff] %v1145_v29 }
  0xc4   : > { %1198 = vst [vmem:[#allocation1 + $0x5] ss:$9 sm:$0xff] %v1146_v16  ;;  %v1004_v30 = vpop.permute.xlu0 %1003  ;;  %v1006_v34 = vpop.permute.xlu2 %1005 }
  0xc5   : > { %v1107_v18 = vsel %vm1104_vm12, %v1099_v15, %v1004_v30 }
  0xc6   : > { %v1115_v19 = vsel %vm1112_vm13, %v1107_v18, %v1026_v12 }
  0xc7   : > { %v1123_v40 = vsel %vm1120_vm14, %v1115_v19, %v1048_v63 }
  0xc8   : > { %v1147_v33 = vrot.slane %v1123_v40, 1  ;;  %1199 = vst [vmem:[#allocation1 + $0x6] ss:$9 sm:$0xff] %v1123_v40  ;;  %v1148_v3 = vrot.slane %v1123_v40, 2  ;;  %v1149_v7 = vrot.slane %v1123_v40, 3  ;;  %v1150_v41 = vrot.slane %v1123_v40, 4 }
  0xc9   : > { %v1151_v45 = vrot.slane %v1123_v40, 5  ;;  %v1152_v50 = vrot.slane %v1123_v40, 6 }
  0xca   : > { %1200 = vst [vmem:[#allocation1 + $0x7] ss:$9 sm:$0xff] %v1147_v33  ;;  %v900_v35 = vpop.permute.xlu1 %899 }
  0xcc   : > { %v865_v38 = vpop.permute.xlu0 %864  ;;  %v867_v44 = vpop.permute.xlu2 %866 }
  0xcd   : > { %v1068_v32 = vsel %vm1064_vm7, %v3358_v61, %v865_v38  ;;  %v1069_v57 = vsel %vm1064_vm7, %v3406_v48, %v867_v44 }
  0xce   : > { %v1076_v42 = vsel %vm1072_vm8, %v1068_v32, %v900_v35 }
  0xcf   : > { %v1084_v61 = vsel %vm1080_vm9, %v1076_v42, %v928_v27 }
  0xd1   : > { %v1201_v20 = vld [vmem:[#allocation1] sm:$0xff] }
  0xd2   : > { %1202 = vst [vmem:[#allocation1] ss:$9 sm:$0xff] %v1148_v3  ;;  %v1247_v43 = vpack.c.bf16 %v1201_v20, %v1192_v2  ;;  %v984_v5 = vpop.permute.xlu1 %983 }
  0xd3   : > { %1203 = vst [vmem:[#allocation1 + $0x1] ss:$9 sm:$0xff] %v1149_v7 }
  0xd4   : > { %1204 = vst [vmem:[#allocation1 + $0x2] ss:$9 sm:$0xff] %v1150_v41  ;;  %2638 = vmatmul.msk.bf16.vlgmr.msra.gmra.mxu0 %vm1291_vm15, %v1247_v43  ;;  %v956_v6 = vpop.permute.xlu0 %955  ;;  %v958_v51 = vpop.permute.xlu2 %957 }
  0xd5   : > { %1205 = vst [vmem:[#allocation1 + $0x3] ss:$9 sm:$0xff] %v1151_v45  ;;  %v1092_v46 = vsel %vm1088_vm10, %v1084_v61, %v956_v6 }
  0xd6   : > { %1206 = vst [vmem:[#allocation1 + $0x4] ss:$9 sm:$0xff] %v1152_v50  ;;  %v1100_v4 = vsel %vm1096_vm11, %v1092_v46, %v984_v5 }
  0xd7   : > { %v1108_v8 = vsel %vm1104_vm12, %v1100_v4, %v1006_v34 }
  0xda   : > { %v1050_v47 = vpop.permute.xlu1 %1049 }
  0xdc   : > { %v1028_v49 = vpop.permute.xlu0 %1027  ;;  %v1030_v21 = vpop.permute.xlu2 %1029 }
  0xdd   : > { %v1116_v52 = vsel %vm1112_vm13, %v1108_v8, %v1028_v49 }
  0xde   : > { %v1124_v53 = vsel %vm1120_vm14, %v1116_v52, %v1050_v47 }
  0xdf   : > { %v1153_v54 = vrot.slane %v1124_v53, 1  ;;  %v1154_v55 = vrot.slane %v1124_v53, 2  ;;  %1207 = vst [vmem:[#allocation1 + $0x5] ss:$9 sm:$0xff] %v1124_v53  ;;  %v1155_v59 = vrot.slane %v1124_v53, 3  ;;  %v1156_v60 = vrot.slane %v1124_v53, 4 }
  0xe0   : > { %v1157_v1 = vrot.slane %v1124_v53, 5  ;;  %v1158_v9 = vrot.slane %v1124_v53, 6 }
  0xe1   : > { %1208 = vst [vmem:[#allocation1 + $0x6] ss:$9 sm:$0xff] %v1153_v54 }
  0xe2   : > { %1209 = vst [vmem:[#allocation1 + $0x7] ss:$9 sm:$0xff] %v1154_v55  ;;  %v930_v56 = vpop.permute.xlu1 %929 }
  0xe4   : > { %v902_v39 = vpop.permute.xlu0 %901  ;;  %v904_v25 = vpop.permute.xlu2 %903 }
  0xe5   : > { %v1077_v58 = vsel %vm1072_vm8, %v1069_v57, %v902_v39 }
  0xe6   : > { %v1085_v62 = vsel %vm1080_vm9, %v1077_v58, %v930_v56 }
  0xe7   : > { %v1093_v13 = vsel %vm1088_vm10, %v1085_v62, %v958_v51 }
  0xe9   : > { %v1210_v37 = vld [vmem:[#allocation1] sm:$0xff] }
  0xea   : > { %1211 = vst [vmem:[#allocation1] ss:$9 sm:$0xff] %v1155_v59  ;;  %v1008_v63 = vpop.permute.xlu1 %1007 }
  0xeb   : > { %1212 = vst [vmem:[#allocation1 + $0x1] ss:$9 sm:$0xff] %v1156_v60 }
  0xec   : > { %1213 = vst [vmem:[#allocation1 + $0x2] ss:$9 sm:$0xff] %v1157_v1  ;;  %v986_v10 = vpop.permute.xlu0 %985  ;;  %v988_v29 = vpop.permute.xlu2 %987 }
  0xed   : > { %1214 = vst [vmem:[#allocation1 + $0x3] ss:$9 sm:$0xff] %v1158_v9  ;;  %v1101_v48 = vsel %vm1096_vm11, %v1093_v13, %v986_v10  ;;  %v3670_v10 = vld [vmem:[%s4158_s2] ss:$0 sm:$0xff] }
  0xee   : > { %v1109_v17 = vsel %vm1104_vm12, %v1101_v48, %v1008_v63 }
  0xef   : > { %v1117_v23 = vsel %vm1112_vm13, %v1109_v17, %v1030_v21 }
  0xf2   : > { %v869_v22 = vpop.permute.xlu1 %868 }
  0xf3   : > { %v1070_v14 = vsel %vm1064_vm7, %v3456_v36, %v869_v22 }
  0xf4   : > { %v1052_v24 = vpop.permute.xlu0 %1051  ;;  %v1078_v16 = vsel %vm1072_vm8, %v1070_v14, %v904_v25  ;;  %v1054_v38 = vpop.permute.xlu2 %1053 }
  0xf5   : > { %v1125_v26 = vsel %vm1120_vm14, %v1117_v23, %v1052_v24 }
  0xf6   : > { %v1159_v2 = vrot.slane %v1125_v26, 1  ;;  %v1160_v11 = vrot.slane %v1125_v26, 2  ;;  %v1161_v27 = vrot.slane %v1125_v26, 3  ;;  %1215 = vst [vmem:[#allocation1 + $0x4] ss:$9 sm:$0xff] %v1125_v26  ;;  %v1162_v15 = vrot.slane %v1125_v26, 4 }
  0xf7   : > { %v1163_v30 = vrot.slane %v1125_v26, 5  ;;  %v1164_v40 = vrot.slane %v1125_v26, 6 }
  0xf8   : > { %1216 = vst [vmem:[#allocation1 + $0x5] ss:$9 sm:$0xff] %v1159_v2 }
  0xf9   : > { %1217 = vst [vmem:[#allocation1 + $0x6] ss:$9 sm:$0xff] %v1160_v11 }
  0xfa   : > { %1218 = vst [vmem:[#allocation1 + $0x7] ss:$9 sm:$0xff] %v1161_v27  ;;  %v960_v28 = vpop.permute.xlu1 %959 }
  0xfc   : > { %v932_v31 = vpop.permute.xlu0 %931  ;;  %v934_v50 = vpop.permute.xlu2 %933 }
  0xfd   : > { %v1086_v12 = vsel %vm1080_vm9, %v1078_v16, %v932_v31 }
  0xfe   : > { %v1094_v19 = vsel %vm1088_vm10, %v1086_v12, %v960_v28 }
  0xff   : > { %v1102_v36 = vsel %vm1096_vm11, %v1094_v19, %v988_v29 }
 0x101   : > { %v1219_v18 = vld [vmem:[#allocation1] sm:$0xff] }
 0x102   : > { %1220 = vst [vmem:[#allocation1] ss:$9 sm:$0xff] %v1162_v15  ;;  %v1248_v33 = vpack.c.bf16 %v1219_v18, %v1210_v37  ;;  %v1032_v34 = vpop.permute.xlu1 %1031 }
 0x103   : > { %1221 = vst [vmem:[#allocation1 + $0x1] ss:$9 sm:$0xff] %v1163_v30 }
 0x104   : > { %1222 = vst [vmem:[#allocation1 + $0x2] ss:$9 sm:$0xff] %v1164_v40  ;;  %2639 = vmatmul.msk.bf16.gmra.mxu0 %vm1291_vm15, %v1248_v33  ;;  %v1010_v35 = vpop.permute.xlu0 %1009  ;;  %v1012_v53 = vpop.permute.xlu2 %1011 }
 0x105   : > { %v1110_v32 = vsel %vm1104_vm12, %v1102_v36, %v1010_v35 }
 0x106   : > { %v1118_v3 = vsel %vm1112_vm13, %v1110_v32, %v1032_v34 }
 0x107   : > { %v1126_v7 = vsel %vm1120_vm14, %v1118_v3, %v1054_v38 }
 0x108   : > { %v1165_v20 = vrot.slane %v1126_v7, 1  ;;  %v1166_v41 = vrot.slane %v1126_v7, 2  ;;  %v1167_v42 = vrot.slane %v1126_v7, 3  ;;  %1223 = vst [vmem:[#allocation1 + $0x3] ss:$9 sm:$0xff] %v1126_v7  ;;  %v1168_v43 = vrot.slane %v1126_v7, 4 }
 0x109   : > { %v1169_v46 = vrot.slane %v1126_v7, 5  ;;  %v1170_v4 = vrot.slane %v1126_v7, 6 }
 0x10a   : > { %1224 = vst [vmem:[#allocation1 + $0x4] ss:$9 sm:$0xff] %v1165_v20  ;;  %v906_v5 = vpop.permute.xlu1 %905 }
 0x10b   : > { %1225 = vst [vmem:[#allocation1 + $0x5] ss:$9 sm:$0xff] %v1166_v41 }
 0x10c   : > { %1226 = vst [vmem:[#allocation1 + $0x6] ss:$9 sm:$0xff] %v1167_v42  ;;  %v871_v44 = vpop.permute.xlu0 %870 }
 0x10d   : > { %1227 = vst [vmem:[#allocation1 + $0x7] ss:$9 sm:$0xff] %v1168_v43  ;;  %v1071_v45 = vsel %vm1064_vm7, %v3522_v0, %v871_v44 }
 0x10e   : > { %v1079_v6 = vsel %vm1072_vm8, %v1071_v45, %v906_v5 }
 0x10f   : > { %v1087_v49 = vsel %vm1080_vm9, %v1079_v6, %v934_v50 }
 0x112   : > { %v990_v61 = vpop.permute.xlu1 %989 }
 0x114   : > { %v1228_v47 = vld [vmem:[#allocation1] sm:$0xff]  ;;  %v962_v8 = vpop.permute.xlu0 %961 }
 0x115   : > { %1229 = vst [vmem:[#allocation1] ss:$9 sm:$0xff] %v1169_v46  ;;  %v1095_v51 = vsel %vm1088_vm10, %v1087_v49, %v962_v8 }
 0x116   : > { %1230 = vst [vmem:[#allocation1 + $0x1] ss:$9 sm:$0xff] %v1170_v4  ;;  %v1103_v52 = vsel %vm1096_vm11, %v1095_v51, %v990_v61  ;;  %vm2071_vm11 = vcmask 1042434  }
 0x117   : > { %v1111_v0 = vsel %vm1104_vm12, %v1103_v52, %v1012_v53  ;;  %vm2074_vm12 = vcmask 1041409  }
 0x11a   : > { %v1056_v54 = vpop.permute.xlu1 %1055 }
 0x11c   : > { %v1034_v55 = vpop.permute.xlu0 %1033 }
 0x11d   : > { %v1119_v56 = vsel %vm1112_vm13, %v1111_v0, %v1034_v55  ;;  %vm2076_vm13 = vcmask 1043459  }
 0x11e   : > { %v1127_v57 = vsel %vm1120_vm14, %v1119_v56, %v1056_v54  ;;  %vm2078_vm14 = vcmask 1042433  }
 0x11f   : > { %v1171_v39 = vrot.slane %v1127_v57, 1  ;;  %v1172_v21 = vrot.slane %v1127_v57, 2  ;;  %v1173_v58 = vrot.slane %v1127_v57, 3  ;;  %1231 = vst [vmem:[#allocation1 + $0x2] ss:$9 sm:$0xff] %v1127_v57  ;;  %v1174_v59 = vrot.slane %v1127_v57, 4 }
 0x120   : > { %v1175_v60 = vrot.slane %v1127_v57, 5  ;;  %v1176_v37 = vrot.slane %v1127_v57, 6 }
 0x121   : > { %1232 = vst [vmem:[#allocation1 + $0x3] ss:$9 sm:$0xff] %v1171_v39 }
 0x122   : > { %1233 = vst [vmem:[#allocation1 + $0x4] ss:$9 sm:$0xff] %v1172_v21 }
 0x123   : > { %1234 = vst [vmem:[#allocation1 + $0x5] ss:$9 sm:$0xff] %v1173_v58 }
 0x124   : > { %1235 = vst [vmem:[#allocation1 + $0x6] ss:$9 sm:$0xff] %v1174_v59 }
 0x125   : > { %1236 = vst [vmem:[#allocation1 + $0x7] ss:$9 sm:$0xff] %v1175_v60 }
 0x12c   : > { %v1237_v1 = vld [vmem:[#allocation1] sm:$0xff] }
 0x12d   : > { %1238 = vst [vmem:[#allocation1] ss:$9 sm:$0xff] %v1176_v37  ;;  %v1249_v62 = vpack.c.bf16 %v1237_v1, %v1228_v47 }
 0x12f   : > { %2640 = vmatmul.msk.bf16.gmra.mxu0 %vm1291_vm15, %v1249_v62 }
 0x134   : > { %v1239_v63 = vld [vmem:[#allocation1] sm:$0xff] }
 0x135   : > { %v1250_v9 = vpack.c.bf16 %v1239_v63, %v1239_v63 }
 0x13f   : > { %2641 = vmatmul.msk.bf16.gmra.mxu0 %vm1291_vm15, %v1250_v9  ;;  %vm2082_vm15 = vcmask 1044484  }
 0x151   : > { %v1316_v13 = vpop.f32.mrf.mxu0 }
 0x152   : > { %v1317_v48 = vadd.f32 %v3670_v10, %v1316_v13 }
 0x154   : > { %vm1335_vm4 = vcmp.ge.f32.partialorder %v1317_v48, 0.0  ;;  %v1342_v25 = vmul.f32 0.01, %v1317_v48 }
 0x156   : > { %v1349_v17 = vsel %vm1335_vm4, %v1317_v48, %v1342_v25  ;;  %vm2084_vm4 = vcmask 1043458  }
 0x157   : > { %v1369_v22 = vrot.slane %v1349_v17, 7  ;;  %v1363_v31 = vrot.slane %v1349_v17, 1  ;;  %v1364_v12 = vrot.slane %v1349_v17, 2  ;;  %v1365_v30 = vrot.slane %v1349_v17, 3 }
 0x158   : > { %v1366_v33 = vrot.slane %v1349_v17, 4  ;;  %v1367_v34 = vrot.slane %v1349_v17, 5  ;;  %v1368_v32 = vrot.slane %v1349_v17, 6 }
 0x159   : > { %v1318_v23 = vpop.f32.mrf.mxu0  ;;  %1412 = vst [vmem:[#allocation1 + $0x1] ss:$9 sm:$0xff] %v1369_v22 }
 0x15a   : > { %v1319_v24 = vadd.f32 %v3670_v10, %v1318_v23  ;;  %v1562_v49 = vrot.slane %v1367_v34, 4 }
 0x15c   : > { %vm1336_vm5 = vcmp.ge.f32.partialorder %v1319_v24, 0.0  ;;  %v1343_v26 = vmul.f32 0.01, %v1319_v24 }
 0x15e   : > { %v3674_v2 = vsel %vm1336_vm5, %v1319_v24, %v1343_v26 }
 0x15f   : > { %v1370_v11 = vrot.slane %v3674_v2, 1  ;;  %v1371_v27 = vrot.slane %v3674_v2, 2  ;;  %v1372_v14 = vrot.slane %v3674_v2, 3  ;;  %1414 = vst [vmem:[#allocation1 + $0x2] ss:$9 sm:$0xff] %v3674_v2  ;;  %v3681_v28 = vrot.slane %v3674_v2, 4 }
 0x160   : > { %v1374_v29 = vrot.slane %v3674_v2, 5  ;;  %v1375_v59 = vrot.slane %v3674_v2, 6  ;;  %v1376_v60 = vrot.slane %v3674_v2, 7 }
 0x161   : > { %1416 = vst [vmem:[#allocation1 + $0x3] ss:$9 sm:$0xff] %v1370_v11  ;;  %v1561_v3 = vrot.slane %v3681_v28, 4 }
 0x162   : > { %1418 = vst [vmem:[#allocation1 + $0x4] ss:$9 sm:$0xff] %v1371_v27 }
 0x163   : > { %1420 = vst [vmem:[#allocation1 + $0x5] ss:$9 sm:$0xff] %v1372_v14 }
 0x164   : > { %1422 = vst [vmem:[#allocation1 + $0x6] ss:$9 sm:$0xff] %v3681_v28 }
 0x165   : > { %1424 = vst [vmem:[#allocation1 + $0x7] ss:$9 sm:$0xff] %v1374_v29 }
 0x16c   : > { %v1425_v16 = vld [vmem:[#allocation1] sm:$0xff] }
 0x16d   : > { %1426 = vst [vmem:[#allocation1 + $0x1] ss:$9 sm:$0xff] %v1349_v17  ;;  %v1497_v15 = vsel %vm604_vm0, %v3674_v2, %v1425_v16 }
 0x16e   : > { %1427 = vst [vmem:[#allocation1 + $0x2] ss:$9 sm:$0xff] %v1363_v31  ;;  %v1513_v18 = vrot.slane %v1497_v15, 1  ;;  %v1529_v19 = vrot.slane %v1497_v15, 2  ;;  %v1545_v40 = vrot.slane %v1497_v15, 3  ;;  %v1606_v35 = vrot.slane %v1497_v15, 4 }
 0x16f   : > { %1428 = vst [vmem:[#allocation1 + $0x3] ss:$9 sm:$0xff] %v1364_v12 }
 0x170   : > { %1429 = vst [vmem:[#allocation1 + $0x4] ss:$9 sm:$0xff] %v1365_v30  ;;  %v1574_v36 = vsel %vm604_vm0, %v1497_v15, %v1513_v18  ;;  %v1622_v38 = vsel %vm604_vm0, %v1513_v18, %v1529_v19 }
 0x171   : > { %1430 = vst [vmem:[#allocation1 + $0x5] ss:$9 sm:$0xff] %v1366_v33  ;;  %v1582_v7 = vsel %vm620_vm1, %v1574_v36, %v1529_v19  ;;  %v1630_v20 = vsel %vm620_vm1, %v1622_v38, %v1545_v40 }
 0x172   : > { %1431 = vst [vmem:[#allocation1 + $0x6] ss:$9 sm:$0xff] %v1367_v34  ;;  %v1590_v41 = vsel %vm636_vm2, %v1582_v7, %v1545_v40  ;;  %v1638_v42 = vsel %vm636_vm2, %v1630_v20, %v1606_v35 }
 0x173   : > { %1432 = vst [vmem:[#allocation1 + $0x7] ss:$9 sm:$0xff] %v1368_v32  ;;  %v1598_v43 = vsel %vm652_vm3, %v1590_v41, %v1561_v3  ;;  %v1662_v5 = vrot.slane %v1638_v42, 4 }
 0x175   : > { %v3698_v44 = vsel %vm652_vm3, %v1598_v43, %v1662_v5  ;;  %v2944_v43 = vld [vmem:[%s4159_s3 + $0x30] sm:$0xff] }
 0x17a   : > { %v1433_v45 = vld [vmem:[#allocation1] sm:$0xff] }
 0x17b   : > { %1434 = vst [vmem:[#allocation1 + $0x1] ss:$9 sm:$0xff] %v1369_v22  ;;  %v1498_v50 = vsel %vm604_vm0, %v1363_v31, %v1433_v45 }
 0x17c   : > { %1435 = vst [vmem:[#allocation1 + $0x2] ss:$9 sm:$0xff] %v3674_v2  ;;  %v1514_v6 = vrot.slane %v1498_v50, 1  ;;  %v1530_v61 = vrot.slane %v1498_v50, 2  ;;  %v1546_v46 = vrot.slane %v1498_v50, 3  ;;  %v1607_v4 = vrot.slane %v1498_v50, 4 }
 0x17d   : > { %1436 = vst [vmem:[#allocation1 + $0x3] ss:$9 sm:$0xff] %v1370_v11 }
 0x17e   : > { %1437 = vst [vmem:[#allocation1 + $0x4] ss:$9 sm:$0xff] %v1371_v27  ;;  %v1575_v47 = vsel %vm604_vm0, %v1498_v50, %v1514_v6  ;;  %v1623_v8 = vsel %vm604_vm0, %v1514_v6, %v1530_v61 }
 0x17f   : > { %1438 = vst [vmem:[#allocation1 + $0x5] ss:$9 sm:$0xff] %v1372_v14  ;;  %v1583_v51 = vsel %vm620_vm1, %v1575_v47, %v1530_v61  ;;  %v1631_v52 = vsel %vm620_vm1, %v1623_v8, %v1546_v46  ;;  %v2945_v14 = vld [vmem:[%s4159_s3 + $0x38] sm:$0xff]  ;;  %v2943_v47 = vld [vmem:[%s4159_s3 + $0x28] sm:$0xff] }
 0x180   : > { %1439 = vst [vmem:[#allocation1 + $0x6] ss:$9 sm:$0xff] %v3681_v28  ;;  %v1591_v53 = vsel %vm636_vm2, %v1583_v51, %v1546_v46  ;;  %v1639_v54 = vsel %vm636_vm2, %v1631_v52, %v1607_v4  ;;  %1973 = vmatpush.bf16.msra.mxu1 %v2945_v14  ;;  %v2953_v52 = vld [vmem:[%s4159_s3 + $0x78] sm:$0xff] }
 0x181   : > { %1440 = vst [vmem:[#allocation1 + $0x7] ss:$9 sm:$0xff] %v1374_v29  ;;  %v1321_v0 = vpop.f32.mrf.mxu0  ;;  %v1599_v55 = vsel %vm652_vm3, %v1591_v53, %v1562_v49  ;;  %v1663_v56 = vrot.slane %v1639_v54, 4  ;;  %v2942_v49 = vld [vmem:[%s4159_s3 + $0x20] sm:$0xff]  ;;  %1987 = vmatpush.bf16.msra.mxu2 %v2953_v52 }
 0x182   : > { %v1322_v57 = vadd.f32 %v3670_v10, %v1321_v0 }
 0x183   : > { %v3712_v39 = vsel %vm652_vm3, %v1599_v55, %v1663_v56 }
 0x184   : > { %vm1337_vm6 = vcmp.ge.f32.partialorder %v1322_v57, 0.0  ;;  %v1344_v21 = vmul.f32 0.01, %v1322_v57  ;;  %1974 = vmatpush.bf16.msra.mxu1 %v2944_v43  ;;  %v2949_v43 = vld [vmem:[%s4159_s3 + $0x58] sm:$0xff] }
 0x186   : > { %v3714_v58 = vsel %vm1337_vm6, %v1322_v57, %v1344_v21 }
 0x187   : > { %v1377_v1 = vrot.slane %v3714_v58, 1  ;;  %v1378_v63 = vrot.slane %v3714_v58, 2  ;;  %v1379_v17 = vrot.slane %v3714_v58, 3  ;;  %v1380_v22 = vrot.slane %v3714_v58, 4 }
 0x188   : > { %v1441_v37 = vld [vmem:[#allocation1] sm:$0xff]  ;;  %v1381_v19 = vrot.slane %v3714_v58, 5  ;;  %v1382_v40 = vrot.slane %v3714_v58, 6  ;;  %v1383_v34 = vrot.slane %v3714_v58, 7  ;;  %1975 = vmatpush.bf16.msra.mxu1 %v2943_v47  ;;  %v2957_v47 = vld [vmem:[%s4159_s3 + $0x98] sm:$0xff] }
 0x189   : > { %1442 = vst [vmem:[#allocation1 + $0x1] ss:$9 sm:$0xff] %v1375_v59  ;;  %v1499_v62 = vsel %vm604_vm0, %v3674_v2, %v1441_v37  ;;  %v1323_v9 = vpop.f32.mrf.mxu0  ;;  %v1563_v5 = vrot.slane %v1379_v17, 4  ;;  %v2941_v59 = vld [vmem:[%s4159_s3 + $0x18] sm:$0xff] }
 0x18a   : > { %1443 = vst [vmem:[#allocation1 + $0x2] ss:$9 sm:$0xff] %v1376_v60  ;;  %v1515_v13 = vrot.slane %v1499_v62, 1  ;;  %v1531_v48 = vrot.slane %v1499_v62, 2  ;;  %v1547_v25 = vrot.slane %v1499_v62, 3  ;;  %v1608_v24 = vrot.slane %v1499_v62, 4 }
 0x18b   : > { %1444 = vst [vmem:[#allocation1 + $0x3] ss:$9 sm:$0xff] %v3714_v58  ;;  %v1324_v2 = vadd.f32 %v3670_v10, %v1323_v9 }
 0x18c   : > { %v1576_v23 = vsel %vm604_vm0, %v1499_v62, %v1515_v13  ;;  %v1624_v26 = vsel %vm604_vm0, %v1515_v13, %v1531_v48  ;;  %1445 = vst [vmem:[#allocation1 + $0x4] ss:$9 sm:$0xff] %v1377_v1  ;;  %1976 = vmatpush.bf16.msra.mxu1 %v2942_v49  ;;  %v2967_v49 = vld [vmem:[%s4159_s3 + $0xe8] sm:$0xff] }
 0x18d   : > { %v1584_v11 = vsel %vm620_vm1, %v1576_v23, %v1531_v48  ;;  %v1632_v27 = vsel %vm620_vm1, %v1624_v26, %v1547_v25  ;;  %1446 = vst [vmem:[#allocation1 + $0x5] ss:$9 sm:$0xff] %v1378_v63  ;;  %v1345_v15 = vmul.f32 0.01, %v1324_v2  ;;  %vm1338_vm7 = vcmp.ge.f32.partialorder %v1324_v2, 0.0  ;;  %v2952_v26 = vld [vmem:[%s4159_s3 + $0x70] sm:$0xff] }
 0x18e   : > { %v1592_v29 = vsel %vm636_vm2, %v1584_v11, %v1547_v25  ;;  %v1640_v31 = vsel %vm636_vm2, %v1632_v27, %v1608_v24  ;;  %1447 = vst [vmem:[#allocation1 + $0x6] ss:$9 sm:$0xff] %v1379_v17  ;;  %1988 = vmatpush.bf16.msra.mxu2 %v2952_v26 }
 0x18f   : > { %v1600_v16 = vsel %vm652_vm3, %v1592_v29, %v1561_v3  ;;  %v1664_v12 = vrot.slane %v1640_v31, 4  ;;  %1448 = vst [vmem:[#allocation1 + $0x7] ss:$9 sm:$0xff] %v1380_v22  ;;  %v3741_v18 = vsel %vm1338_vm7, %v1324_v2, %v1345_v15  ;;  %v2961_v15 = vld [vmem:[%s4159_s3 + $0xb8] sm:$0xff] }
 0x190   : > { %v1384_v36 = vrot.slane %v3741_v18, 1  ;;  %v1385_v3 = vrot.slane %v3741_v18, 2  ;;  %v1386_v7 = vrot.slane %v3741_v18, 3  ;;  %v1387_v51 = vrot.slane %v3741_v18, 4  ;;  %1977 = vmatpush.bf16.msra.mxu1 %v2941_v59  ;;  %2001 = vmatpush.bf16.msra.mxu3 %v2961_v15 }
 0x191   : > { %v3739_v30 = vsel %vm652_vm3, %v1600_v16, %v1664_v12  ;;  %v1388_v53 = vrot.slane %v3741_v18, 5  ;;  %v1389_v0 = vrot.slane %v3741_v18, 6  ;;  %v1390_v56 = vrot.slane %v3741_v18, 7  ;;  %v2940_v16 = vld [vmem:[%s4159_s3 + $0x10] sm:$0xff]  ;;  %v2951_v12 = vld [vmem:[%s4159_s3 + $0x68] sm:$0xff] }
 0x192   : > { %v1564_v62 = vrot.slane %v1385_v3, 4  ;;  %1989 = vmatpush.bf16.msra.mxu2 %v2951_v12 }
 0x194   : > { %1978 = vmatpush.bf16.msra.mxu1 %v2940_v16 }
 0x196   : > { %v1449_v33 = vld [vmem:[#allocation1] sm:$0xff] }
 0x197   : > { %1450 = vst [vmem:[#allocation1 + $0x1] ss:$9 sm:$0xff] %v1381_v19  ;;  %v1500_v28 = vsel %vm604_vm0, %v1376_v60, %v1449_v33 }
 0x198   : > { %1451 = vst [vmem:[#allocation1 + $0x2] ss:$9 sm:$0xff] %v1382_v40  ;;  %v1516_v35 = vrot.slane %v1500_v28, 1  ;;  %v1532_v38 = vrot.slane %v1500_v28, 2  ;;  %v1548_v32 = vrot.slane %v1500_v28, 3  ;;  %v1609_v41 = vrot.slane %v1500_v28, 4 }
 0x199   : > { %1452 = vst [vmem:[#allocation1 + $0x3] ss:$9 sm:$0xff] %v1383_v34  ;;  %v2950_v34 = vld [vmem:[%s4159_s3 + $0x60] sm:$0xff] }
 0x19a   : > { %v1577_v20 = vsel %vm604_vm0, %v1500_v28, %v1516_v35  ;;  %v1625_v42 = vsel %vm604_vm0, %v1516_v35, %v1532_v38  ;;  %1453 = vst [vmem:[#allocation1 + $0x4] ss:$9 sm:$0xff] %v3741_v18  ;;  %v2960_v28 = vld [vmem:[%s4159_s3 + $0xb0] sm:$0xff]  ;;  %1990 = vmatpush.bf16.msra.mxu2 %v2950_v34 }
 0x19b   : > { %v1585_v45 = vsel %vm620_vm1, %v1577_v20, %v1532_v38  ;;  %v1633_v50 = vsel %vm620_vm1, %v1625_v42, %v1548_v32  ;;  %1454 = vst [vmem:[#allocation1 + $0x5] ss:$9 sm:$0xff] %v1384_v36  ;;  %2002 = vmatpush.bf16.msra.mxu3 %v2960_v28  ;;  %v2938_v42 = vld [vmem:[%s4159_s3] sm:$0xff] }
 0x19c   : > { %v1593_v6 = vsel %vm636_vm2, %v1585_v45, %v1548_v32  ;;  %v1641_v61 = vsel %vm636_vm2, %v1633_v50, %v1609_v41  ;;  %1455 = vst [vmem:[#allocation1 + $0x6] ss:$9 sm:$0xff] %v1385_v3  ;;  %v2969_v45 = vld [vmem:[%s4159_s3 + $0xf8] sm:$0xff]  ;;  %v2948_v50 = vld [vmem:[%s4159_s3 + $0x50] sm:$0xff] }
 0x19d   : > { %v1601_v46 = vsel %vm652_vm3, %v1593_v6, %v1563_v5  ;;  %v1665_v4 = vrot.slane %v1641_v61, 4  ;;  %1456 = vst [vmem:[#allocation1 + $0x7] ss:$9 sm:$0xff] %v1386_v7  ;;  %v2959_v5 = vld [vmem:[%s4159_s3 + $0xa8] sm:$0xff]  ;;  %v2958_v6 = vld [vmem:[%s4159_s3 + $0xa0] sm:$0xff]  ;;  %v2968_v61 = vld [vmem:[%s4159_s3 + $0xf0] sm:$0xff] }
 0x19e   : > { %1991 = vmatpush.bf16.msra.mxu2 %v2949_v43 }
 0x19f   : > { %v3765_v8 = vsel %vm652_vm3, %v1601_v46, %v1665_v4  ;;  %2003 = vmatpush.bf16.msra.mxu3 %v2959_v5  ;;  %v2947_v4 = vld [vmem:[%s4159_s3 + $0x48] sm:$0xff] }
 0x1a2   : > { %1992 = vmatpush.bf16.msra.mxu2 %v2948_v50 }
 0x1a3   : > { %2004 = vmatpush.bf16.msra.mxu3 %v2958_v6 }
 0x1a4   : > { %v1457_v54 = vld [vmem:[#allocation1] sm:$0xff] }
 0x1a5   : > { %1458 = vst [vmem:[#allocation1 + $0x1] ss:$9 sm:$0xff] %v1387_v51  ;;  %v1501_v55 = vsel %vm604_vm0, %v1382_v40, %v1457_v54  ;;  %v2939_v40 = vld [vmem:[%s4159_s3 + $0x8] sm:$0xff] }
 0x1a6   : > { %1459 = vst [vmem:[#allocation1 + $0x2] ss:$9 sm:$0xff] %v1388_v53  ;;  %v1517_v57 = vrot.slane %v1501_v55, 1  ;;  %v1533_v21 = vrot.slane %v1501_v55, 2  ;;  %v1549_v58 = vrot.slane %v1501_v55, 3  ;;  %v1610_v37 = vrot.slane %v1501_v55, 4  ;;  %1979 = vmatpush.bf16.msra.mxu1 %v2939_v40  ;;  %1993 = vmatpush.bf16.msra.mxu2 %v2947_v4 }
 0x1a7   : > { %1460 = vst [vmem:[#allocation1 + $0x3] ss:$9 sm:$0xff] %v1389_v0  ;;  %2005 = vmatpush.bf16.msra.mxu3 %v2957_v47 }
 0x1a8   : > { %1461 = vst [vmem:[#allocation1 + $0x4] ss:$9 sm:$0xff] %v1390_v56  ;;  %v1578_v60 = vsel %vm604_vm0, %v1501_v55, %v1517_v57  ;;  %v1626_v1 = vsel %vm604_vm0, %v1517_v57, %v1533_v21  ;;  %v2946_v55 = vld [vmem:[%s4159_s3 + $0x40] sm:$0xff]  ;;  %v2956_v56 = vld [vmem:[%s4159_s3 + $0x90] sm:$0xff] }
 0x1a9   : > { %v1586_v63 = vsel %vm620_vm1, %v1578_v60, %v1533_v21  ;;  %v1634_v9 = vsel %vm620_vm1, %v1626_v1, %v1549_v58  ;;  %v2955_v1 = vld [vmem:[%s4159_s3 + $0x88] sm:$0xff] }
 0x1aa   : > { %v1594_v13 = vsel %vm636_vm2, %v1586_v63, %v1549_v58  ;;  %v1642_v48 = vsel %vm636_vm2, %v1634_v9, %v1610_v37  ;;  %1980 = vmatpush.bf16.msra.mxu1 %v2938_v42  ;;  %1994 = vmatpush.bf16.msra.mxu2 %v2946_v55 }
 0x1ab   : > { %v1602_v25 = vsel %vm652_vm3, %v1594_v13, %v1564_v62  ;;  %v1666_v17 = vrot.slane %v1642_v48, 4  ;;  %2006 = vmatpush.bf16.msra.mxu3 %v2956_v56  ;;  %v2965_v62 = vld [vmem:[%s4159_s3 + $0xd8] sm:$0xff] }
 0x1ac   : > { %v1326_v22 = vpop.f32.mrf.mxu0 }
 0x1ad   : > { %v3791_v23 = vsel %vm652_vm3, %v1602_v25, %v1666_v17  ;;  %v1327_v24 = vadd.f32 %v3670_v10, %v1326_v22  ;;  %v2954_v25 = vld [vmem:[%s4159_s3 + $0x80] sm:$0xff]  ;;  %v2964_v17 = vld [vmem:[%s4159_s3 + $0xd0] sm:$0xff] }
 0x1ae   : > { %2015 = vmatpush.bf16.msrb.mxu1 %v2969_v45 }
 0x1af   : > { %vm1339_vm8 = vcmp.ge.f32.partialorder %v1327_v24, 0.0  ;;  %v1346_v2 = vmul.f32 0.01, %v1327_v24  ;;  %2007 = vmatpush.bf16.msra.mxu3 %v2955_v1  ;;  %v3027_v1 = vld [vmem:[%s4160_s4] ss:$0 sm:$0xff] }
 0x1b1   : > { %v3797_v11 = vsel %vm1339_vm8, %v1327_v24, %v1346_v2 }
 0x1b2   : > { %v1391_v27 = vrot.slane %v3797_v11, 1  ;;  %v1392_v14 = vrot.slane %v3797_v11, 2  ;;  %1462 = vst [vmem:[#allocation1 + $0x5] ss:$9 sm:$0xff] %v3797_v11  ;;  %v1393_v33 = vrot.slane %v3797_v11, 3  ;;  %v3825_v36 = vrot.slane %v3797_v11, 4  ;;  %2016 = vmatpush.bf16.msrb.mxu1 %v2968_v61 }
 0x1b3   : > { %v1395_v3 = vrot.slane %v3797_v11, 5  ;;  %v1396_v7 = vrot.slane %v3797_v11, 6  ;;  %v1397_v20 = vrot.slane %v3797_v11, 7  ;;  %2008 = vmatpush.bf16.msra.mxu3 %v2954_v25 }
 0x1b4   : > { %1463 = vst [vmem:[#allocation1 + $0x6] ss:$9 sm:$0xff] %v1391_v27  ;;  %v1328_v29 = vpop.f32.mrf.mxu0 }
 0x1b5   : > { %1464 = vst [vmem:[#allocation1 + $0x7] ss:$9 sm:$0xff] %v1392_v14  ;;  %v1329_v31 = vadd.f32 %v3670_v10, %v1328_v29  ;;  %v2963_v14 = vld [vmem:[%s4159_s3 + $0xc8] sm:$0xff] }
 0x1b6   : > { %2017 = vmatpush.bf16.msrb.mxu1 %v2967_v49 }
 0x1b7   : > { %v1347_v19 = vmul.f32 0.01, %v1329_v31  ;;  %vm1340_vm9 = vcmp.ge.f32.partialorder %v1329_v31, 0.0 }
 0x1b9   : > { %v3829_v38 = vsel %vm1340_vm9, %v1329_v31, %v1347_v19 }
 0x1ba   : > { %v1398_v41 = vrot.slane %v3829_v38, 1  ;;  %v1404_v52 = vrot.slane %v3829_v38, 7  ;;  %v1399_v54 = vrot.slane %v3829_v38, 2  ;;  %v1400_v57 = vrot.slane %v3829_v38, 3 }
 0x1bb   : > { %v1401_v21 = vrot.slane %v3829_v38, 4  ;;  %v1402_v59 = vrot.slane %v3829_v38, 5  ;;  %v1403_v60 = vrot.slane %v3829_v38, 6 }
 0x1bc   : > { %v3827_v35 = vld [vmem:[#allocation1] sm:$0xff]  ;;  %v1331_v32 = vpop.f32.mrf.mxu0 }
 0x1bd   : > { %1466 = vst [vmem:[#allocation1 + $0x1] ss:$9 sm:$0xff] %v1393_v33  ;;  %v1332_v51 = vadd.f32 %v3670_v10, %v1331_v32  ;;  %v2966_v10 = vld [vmem:[%s4159_s3 + $0xe0] sm:$0xff]  ;;  %v1502_v9 = vsel %vm604_vm0, %v1388_v53, %v3827_v35 }
 0x1be   : > { %1467 = vst [vmem:[#allocation1 + $0x2] ss:$9 sm:$0xff] %v3825_v36  ;;  %2018 = vmatpush.bf16.msrb.mxu1 %v2966_v10  ;;  %v1518_v22 = vrot.slane %v1502_v9, 1  ;;  %v1534_v24 = vrot.slane %v1502_v9, 2  ;;  %v1550_v2 = vrot.slane %v1502_v9, 3  ;;  %v1611_v42 = vrot.slane %v1502_v9, 4 }
 0x1bf   : > { %1468 = vst [vmem:[#allocation1 + $0x3] ss:$9 sm:$0xff] %v1395_v3  ;;  %v1348_v58 = vmul.f32 0.01, %v1332_v51  ;;  %vm1341_vm10 = vcmp.ge.f32.partialorder %v1332_v51, 0.0 }
 0x1c0   : > { %1469 = vst [vmem:[#allocation1 + $0x4] ss:$9 sm:$0xff] %v1396_v7  ;;  %v1579_v29 = vsel %vm604_vm0, %v1502_v9, %v1518_v22  ;;  %v1627_v31 = vsel %vm604_vm0, %v1518_v22, %v1534_v24  ;;  %v2985_v22 = vld [vmem:[%s4161_s5 + $0x78] sm:$0xff] }
 0x1c1   : > { %1470 = vst [vmem:[#allocation1 + $0x5] ss:$9 sm:$0xff] %v1397_v20  ;;  %v1355_v63 = vsel %vm1341_vm10, %v1332_v51, %v1348_v58  ;;  %v1587_v32 = vsel %vm620_vm1, %v1579_v29, %v1534_v24  ;;  %v1635_v43 = vsel %vm620_vm1, %v1627_v31, %v1550_v2  ;;  %v1566_v51 = vrot.slane %v1404_v52, 4  ;;  %v3001_v24 = vld [vmem:[%s4161_s5 + $0xf8] sm:$0xff]  ;;  %2419 = vmatpush.bf16.msrb.mxu3 %v2985_v22  ;;  %v3000_v31 = vld [vmem:[%s4161_s5 + $0xf0] sm:$0xff] }
 0x1c2   : > { %1471 = vst [vmem:[#allocation1 + $0x6] ss:$9 sm:$0xff] %v3829_v38  ;;  %2019 = vmatpush.bf16.msrb.mxu1 %v2965_v62  ;;  %v1595_v49 = vsel %vm636_vm2, %v1587_v32, %v1550_v2  ;;  %v2984_v2 = vld [vmem:[%s4161_s5 + $0x70] sm:$0xff]  ;;  %v2999_v32 = vld [vmem:[%s4161_s5 + $0xe8] sm:$0xff] }
 0x1c3   : > { %1472 = vst [vmem:[#allocation1 + $0x7] ss:$9 sm:$0xff] %v1398_v41 }
 0x1c4   : > { %v1333_v46 = vpop.f32.mrf.mxu0 }
 0x1c5   : > { %v1643_v46 = vsel %vm636_vm2, %v1635_v43, %v1611_v42  ;;  %2420 = vmatpush.bf16.msrb.mxu3 %v2984_v2 }
 0x1c6   : > { %2020 = vmatpush.bf16.msrb.mxu1 %v2964_v17  ;;  %v1667_v55 = vrot.slane %v1643_v46, 4  ;;  %v2977_v17 = vld [vmem:[%s4161_s5 + $0x38] sm:$0xff] }
 0x1c7   : > { %2405 = vmatpush.bf16.msrb.mxu2 %v2977_v17  ;;  %v2973_v46 = vld [vmem:[%s4161_s5 + $0x18] sm:$0xff] }
 0x1ca   : > { %v1473_v0 = vld [vmem:[#allocation1] sm:$0xff]  ;;  %2021 = vmatpush.bf16.msrb.mxu1 %v2963_v14 }
 0x1cb   : > { %1479 = vst [vmem:[#allocation1 + $0x6] ss:$9 sm:$0xff] %v1404_v52  ;;  %v1503_v37 = vsel %vm604_vm0, %v3825_v36, %v1473_v0 }
 0x1cc   : > { %1474 = vst [vmem:[#allocation1 + $0x1] ss:$9 sm:$0xff] %v1399_v54  ;;  %v1519_v13 = vrot.slane %v1503_v37, 1  ;;  %v1535_v48 = vrot.slane %v1503_v37, 2  ;;  %v1551_v26 = vrot.slane %v1503_v37, 3  ;;  %v1612_v19 = vrot.slane %v1503_v37, 4 }
 0x1cd   : > { %1475 = vst [vmem:[#allocation1 + $0x2] ss:$9 sm:$0xff] %v1400_v57  ;;  %v1565_v54 = vrot.slane %v1391_v27, 4 }
 0x1ce   : > { %1476 = vst [vmem:[#allocation1 + $0x3] ss:$9 sm:$0xff] %v1401_v21  ;;  %v1628_v18 = vsel %vm604_vm0, %v1519_v13, %v1535_v48  ;;  %v1580_v53 = vsel %vm604_vm0, %v1503_v37, %v1519_v13  ;;  %v2993_v13 = vld [vmem:[%s4161_s5 + $0xb8] sm:$0xff] }
 0x1cf   : > { %1477 = vst [vmem:[#allocation1 + $0x4] ss:$9 sm:$0xff] %v1402_v59  ;;  %v1636_v16 = vsel %vm620_vm1, %v1628_v18, %v1551_v26  ;;  %v1588_v15 = vsel %vm620_vm1, %v1580_v53, %v1535_v48  ;;  %v1603_v52 = vsel %vm652_vm3, %v1595_v49, %v1565_v54  ;;  %2433 = vmatpush.bf16.msrb.mxu0 %v2993_v13  ;;  %v2992_v18 = vld [vmem:[%s4161_s5 + $0xb0] sm:$0xff] }
 0x1d0   : > { %1478 = vst [vmem:[#allocation1 + $0x5] ss:$9 sm:$0xff] %v1403_v60  ;;  %v1644_v5 = vsel %vm636_vm2, %v1636_v16, %v1612_v19  ;;  %v2976_v53 = vld [vmem:[%s4161_s5 + $0x30] sm:$0xff] }
 0x1d1   : > { %1480 = vst [vmem:[#allocation1 + $0x7] ss:$9 sm:$0xff] %v1355_v63  ;;  %v1668_v4 = vrot.slane %v1644_v5, 4  ;;  %2406 = vmatpush.bf16.msrb.mxu2 %v2976_v53  ;;  %v2972_v54 = vld [vmem:[%s4161_s5 + $0x10] sm:$0xff] }
 0x1d3   : > { %2434 = vmatpush.bf16.msrb.mxu0 %v2992_v18 }
 0x1d8   : > { %v1481_v12 = vld [vmem:[#allocation1] sm:$0xff] }
 0x1d9   : > { %1482 = vst [vmem:[#allocation1 + $0x1] ss:$9 sm:$0xff] %v1393_v33  ;;  %v1504_v40 = vsel %vm604_vm0, %v1400_v57, %v1481_v12  ;;  %v2962_v33 = vld [vmem:[%s4159_s3 + $0xc0] sm:$0xff] }
 0x1da   : > { %1483 = vst [vmem:[#allocation1 + $0x2] ss:$9 sm:$0xff] %v3825_v36  ;;  %v1520_v34 = vrot.slane %v1504_v40, 1  ;;  %v1536_v28 = vrot.slane %v1504_v40, 2  ;;  %v1552_v35 = vrot.slane %v1504_v40, 3  ;;  %v1596_v36 = vsel %vm636_vm2, %v1588_v15, %v1551_v26  ;;  %2022 = vmatpush.bf16.msrb.mxu1 %v2962_v33  ;;  %v2990_v33 = vld [vmem:[%s4161_s5 + $0xa0] sm:$0xff] }
 0x1db   : > { %1484 = vst [vmem:[#allocation1 + $0x3] ss:$9 sm:$0xff] %v1395_v3  ;;  %v1613_v50 = vrot.slane %v1504_v40, 4 }
 0x1dc   : > { %1485 = vst [vmem:[#allocation1 + $0x4] ss:$9 sm:$0xff] %v1396_v7  ;;  %v1581_v45 = vsel %vm604_vm0, %v1504_v40, %v1520_v34  ;;  %v1629_v6 = vsel %vm604_vm0, %v1520_v34, %v1536_v28  ;;  %v2991_v34 = vld [vmem:[%s4161_s5 + $0xa8] sm:$0xff] }
 0x1dd   : > { %1486 = vst [vmem:[#allocation1 + $0x5] ss:$9 sm:$0xff] %v1397_v20  ;;  %v1589_v3 = vsel %vm620_vm1, %v1581_v45, %v1536_v28  ;;  %v1637_v61 = vsel %vm620_vm1, %v1629_v6, %v1552_v35  ;;  %v1604_v20 = vsel %vm652_vm3, %v1596_v36, %v1401_v21  ;;  %v2975_v28 = vld [vmem:[%s4161_s5 + $0x28] sm:$0xff]  ;;  %2435 = vmatpush.bf16.msrb.mxu0 %v2991_v34  ;;  %v2974_v36 = vld [vmem:[%s4161_s5 + $0x20] sm:$0xff] }
 0x1de   : > { %1487 = vst [vmem:[#allocation1 + $0x6] ss:$9 sm:$0xff] %v3829_v38  ;;  %v1597_v47 = vsel %vm636_vm2, %v1589_v3, %v1552_v35  ;;  %v1645_v7 = vsel %vm636_vm2, %v1637_v61, %v1613_v50  ;;  %v1676_v57 = vsel %vm652_vm3, %v1604_v20, %v1668_v4  ;;  %v2983_v35 = vld [vmem:[%s4161_s5 + $0x68] sm:$0xff]  ;;  %2407 = vmatpush.bf16.msrb.mxu2 %v2975_v28  ;;  %v2982_v50 = vld [vmem:[%s4161_s5 + $0x60] sm:$0xff]  ;;  %v2989_v61 = vld [vmem:[%s4161_s5 + $0x98] sm:$0xff] }
 0x1df   : > { %1488 = vst [vmem:[#allocation1 + $0x7] ss:$9 sm:$0xff] %v1398_v41  ;;  %v1669_v0 = vrot.slane %v1645_v7, 4  ;;  %v1605_v56 = vsel %vm652_vm3, %v1597_v47, %v1566_v51  ;;  %2421 = vmatpush.bf16.msrb.mxu3 %v2983_v35  ;;  %v2998_v6 = vld [vmem:[%s4161_s5 + $0xe0] sm:$0xff]  ;;  %v2981_v4 = vld [vmem:[%s4161_s5 + $0x58] sm:$0xff]  ;;  %v2988_v20 = vld [vmem:[%s4161_s5 + $0x90] sm:$0xff] }
 0x1e0   : > { %1678 = vst [vmem:[#allocation1] ss:$2 sm:$0xff] %v3698_v44  ;;  %v1675_v44 = vsel %vm652_vm3, %v1603_v52, %v1667_v55  ;;  %v2997_v47 = vld [vmem:[%s4161_s5 + $0xd8] sm:$0xff]  ;;  %v2996_v55 = vld [vmem:[%s4161_s5 + $0xd0] sm:$0xff] }
 0x1e1   : > { %1680 = vst [vmem:[#allocation1 + $0x1] ss:$2 sm:$0xff] %v3739_v30  ;;  %v1677_v11 = vsel %vm652_vm3, %v1605_v56, %v1669_v0  ;;  %2436 = vmatpush.bf16.msrb.mxu0 %v2990_v33  ;;  %v2980_v0 = vld [vmem:[%s4161_s5 + $0x50] sm:$0xff] }
 0x1e2   : > { %1682 = vst [vmem:[#allocation1 + $0x10] ss:$2 sm:$0xff] %v3712_v39  ;;  %2408 = vmatpush.bf16.msrb.mxu2 %v2974_v36 }
 0x1e3   : > { %1684 = vst [vmem:[#allocation1 + $0x11] ss:$2 sm:$0xff] %v3765_v8  ;;  %2422 = vmatpush.bf16.msrb.mxu3 %v2982_v50 }
 0x1e4   : > { %1686 = vst [vmem:[#allocation1 + $0x20] ss:$2 sm:$0xff] %v3791_v23 }
 0x1e5   : > { %1688 = vst [vmem:[#allocation1 + $0x21] ss:$2 sm:$0xff] %v1676_v57  ;;  %2437 = vmatpush.bf16.msrb.mxu0 %v2989_v61  ;;  %v2971_v57 = vld [vmem:[%s4161_s5 + $0x8] sm:$0xff] }
 0x1e6   : > { %1690 = vst [vmem:[#allocation1 + $0x30] ss:$2 sm:$0xff] %v1675_v44  ;;  %2409 = vmatpush.bf16.msrb.mxu2 %v2973_v46  ;;  %v2979_v44 = vld [vmem:[%s4161_s5 + $0x48] sm:$0xff] }
 0x1e7   : > { %1692 = vst [vmem:[#allocation1 + $0x31] ss:$2 sm:$0xff] %v1677_v11  ;;  %2423 = vmatpush.bf16.msrb.mxu3 %v2981_v4  ;;  %v2987_v11 = vld [vmem:[%s4161_s5 + $0x88] sm:$0xff] }
 0x1e8   : > { %v1693_v30 = vld.sshfl [vmem:[#allocation1] sm:$0xff pattern:$0x75316420]  ;;  %v1694_v27 = vld.sshfl [vmem:[#allocation1 + $0x8] sm:$0xff pattern:$0x75316420] }
 0x1e9   : > { %2438 = vmatpush.bf16.msrb.mxu0 %v2988_v20 }
 0x1ea   : > { %v1695_v58 = vld.sshfl [vmem:[#allocation1 + $0x10] sm:$0xff pattern:$0x75316420]  ;;  %v1696_v23 = vld.sshfl [vmem:[#allocation1 + $0x18] sm:$0xff pattern:$0x75316420]  ;;  %2410 = vmatpush.bf16.msrb.mxu2 %v2972_v54 }
 0x1eb   : > { %2424 = vmatpush.bf16.msrb.mxu3 %v2980_v0 }
 0x1ec   : > { %v1697_v38 = vld.sshfl [vmem:[#allocation1 + $0x20] sm:$0xff pattern:$0x75316420]  ;;  %v1698_v41 = vld.sshfl [vmem:[#allocation1 + $0x28] sm:$0xff pattern:$0x75316420] }
 0x1ed   : > { %v1709_v10 = vpack.c.bf16 %v1697_v38, %v1693_v30  ;;  %v1710_v21 = vpack.c.bf16 %v1698_v41, %v1694_v27  ;;  %v2995_v30 = vld [vmem:[%s4161_s5 + $0xc8] sm:$0xff]  ;;  %v2970_v38 = vld [vmem:[%s4161_s5] sm:$0xff]  ;;  %2439 = vmatpush.bf16.msrb.mxu0 %v2987_v11 }
 0x1ee   : > { %v1699_v59 = vld.sshfl [vmem:[#allocation1 + $0x30] sm:$0xff pattern:$0x75316420]  ;;  %v1700_v8 = vld.sshfl [vmem:[#allocation1 + $0x38] sm:$0xff pattern:$0x75316420]  ;;  %2411 = vmatpush.bf16.msrb.mxu2 %v2971_v57 }
 0x1ef   : > { %1981 = vmatmul.bf16.vlgmr.msra.gmra.mxu1 %v1709_v10  ;;  %1995 = vmatmul.bf16.vlgmr.msra.gmra.mxu2 %v1710_v21  ;;  %v1711_v39 = vpack.c.bf16 %v1699_v59, %v1695_v58  ;;  %v1712_v60 = vpack.c.bf16 %v1700_v8, %v1696_v23  ;;  %v2986_v58 = vld [vmem:[%s4161_s5 + $0x80] sm:$0xff] }
 0x1f0   : > { %2447 = vmatpush.bf16.msra.mxu1 %v3001_v24  ;;  %2425 = vmatpush.bf16.msrb.mxu3 %v2979_v44  ;;  %v2978_v8 = vld [vmem:[%s4161_s5 + $0x40] sm:$0xff] }
 0x1f1   : > { %2009 = vmatmul.bf16.vlgmr.msra.gmra.mxu3 %v1711_v39  ;;  %v2994_v23 = vld [vmem:[%s4161_s5 + $0xc0] sm:$0xff]  ;;  %2440 = vmatpush.bf16.msrb.mxu0 %v2986_v58 }
 0x1f2   : > { %2412 = vmatpush.bf16.msrb.mxu2 %v2970_v38 }
 0x1f4   : > { %2448 = vmatpush.bf16.msra.mxu1 %v3000_v31  ;;  %2426 = vmatpush.bf16.msrb.mxu3 %v2978_v8  ;;  %v3005_v8 = vld [vmem:[%s4163_s7 + $0x18] sm:$0xff] }
 0x1f8   : > { %2449 = vmatpush.bf16.msra.mxu1 %v2999_v32 }
 0x1fc   : > { %2450 = vmatpush.bf16.msra.mxu1 %v2998_v6 }
 0x1ff   : > { %2023 = vmatmul.bf16.vlgmr.msrb.gmra.mxu1 %v1712_v60 }
 0x200   : > { %2451 = vmatpush.bf16.msra.mxu1 %v2997_v47 }
 0x204   : > { %2452 = vmatpush.bf16.msra.mxu1 %v2996_v55 }
 0x208   : > { %2453 = vmatpush.bf16.msra.mxu1 %v2995_v30 }
 0x20c   : > { %2454 = vmatpush.bf16.msra.mxu1 %v2994_v23  ;;  %v3004_v23 = vld [vmem:[%s4163_s7 + $0x10] sm:$0xff] }
 0x26c   : > { %v1982_v37 = vpop.f32.mrf.mxu1 }
 0x26d   : > { %v1983_v48 = vadd.f32 %v3027_v1, %v1982_v37 }
 0x272   : > { %v1996_v62 = vpop.f32.mrf.mxu2 }
 0x273   : > { %v1997_v25 = vadd.f32 %v1996_v62, %v1983_v48 }
 0x274   : > { %v1984_v63 = vpop.f32.mrf.mxu1  ;;  %v2010_v9 = vpop.f32.mrf.mxu3 }
 0x275   : > { %v2011_v26 = vadd.f32 %v2010_v9, %v1997_v25  ;;  %v1985_v16 = vadd.f32 %v3027_v1, %v1984_v63 }
 0x27a   : > { %v1998_v14 = vpop.f32.mrf.mxu2 }
 0x27b   : > { %v1999_v19 = vadd.f32 %v1998_v14, %v1985_v16  ;;  %v3009_v14 = vld [vmem:[%s4163_s7 + $0x38] sm:$0xff] }
 0x27c   : > { %v2024_v29 = vpop.f32.mrf.mxu1  ;;  %v2012_v15 = vpop.f32.mrf.mxu3  ;;  %2536 = vmatpush.bf16.msra.mxu2 %v3009_v14 }
 0x27d   : > { %v2025_v12 = vadd.f32 %v2024_v29, %v2011_v26  ;;  %v2013_v43 = vadd.f32 %v2012_v15, %v1999_v19 }
 0x27f   : > { %vm2029_vm2 = vcmp.ge.f32.partialorder %v2025_v12, 0.0  ;;  %v2031_v40 = vmul.f32 0.01, %v2025_v12 }
 0x281   : > { %v4008_v42 = vsel %vm2029_vm2, %v2025_v12, %v2031_v40 }
 0x282   : > { %v4011_v5 = vrot.slane %v4008_v42, 4  ;;  %2039 = vst [vmem:[#allocation1] ss:$2 sm:$0xff] %v4008_v42 }
 0x284   : > { %2042 = vst [vmem:[#allocation1 + $0x10] ss:$2 sm:$0xff] %v4011_v5  ;;  %v2026_v45 = vpop.f32.mrf.mxu1  ;;  %v2062_v37 = vrot.slane %v4011_v5, 6 }
 0x285   : > { %v2027_v3 = vadd.f32 %v2026_v45, %v2013_v43 }
 0x287   : > { %vm2030_vm3 = vcmp.ge.f32.partialorder %v2027_v3, 0.0  ;;  %v2032_v7 = vmul.f32 0.01, %v2027_v3 }
 0x289   : > { %v2040_v49 = vld.sshfl [vmem:[#allocation1] sm:$0xff pattern:$0x75316420]  ;;  %v4039_v51 = vsel %vm2030_vm3, %v2027_v3, %v2032_v7 }
 0x28a   : > { %2050 = vst [vmem:[#allocation1] ss:$2 sm:$0xff] %v4011_v5  ;;  %v2047_v52 = vrot.slane %v2040_v49, 1  ;;  %v2038_v21 = vrot.slane %v4039_v51, 4  ;;  %v2065_v48 = vrot.slane %v4039_v51, 6 }
 0x28b   : > { %v2043_v56 = vld.sshfl [vmem:[#allocation1 + $0x10] sm:$0xff pattern:$0x75316420]  ;;  %2045 = vst [vmem:[#allocation1 + $0x20] ss:$2 sm:$0xff] %v4039_v51 }
 0x28c   : > { %2053 = vst [vmem:[#allocation1 + $0x10] ss:$2 sm:$0xff] %v4039_v51  ;;  %v2048_v27 = vrot.slane %v2043_v56, 1  ;;  %v2061_v10 = vrot.slane %v2047_v52, 7  ;;  %v2068_v6 = vrot.slane %v2038_v21, 6 }
 0x28e   : > { %v2064_v62 = vrot.slane %v2048_v27, 7  ;;  %v2070_v9 = vsel %vm604_vm0, %v4008_v42, %v2061_v10  ;;  %v2075_v13 = vsel %vm2074_vm12, %v4008_v42, %v2061_v10  ;;  %v2081_v17 = vsel %vm2071_vm11, %v4008_v42, %v2061_v10 }
 0x290   : > { %v2090_v31 = vsel %vm2074_vm12, %v4011_v5, %v2064_v62  ;;  %v2094_v19 = vsel %vm2071_vm11, %v4011_v5, %v2064_v62  ;;  %v2087_v35 = vsel %vm604_vm0, %v4011_v5, %v2064_v62 }
 0x291   : > { %v2051_v41 = vld.sshfl [vmem:[#allocation1] sm:$0xff pattern:$0x75316420] }
 0x292   : > { %v2058_v59 = vrot.slane %v2051_v41, 1  ;;  %v2046_v39 = vld.sshfl [vmem:[#allocation1 + $0x20] sm:$0xff pattern:$0x75316420] }
 0x293   : > { %v2054_v60 = vld.sshfl [vmem:[#allocation1 + $0x10] sm:$0xff pattern:$0x75316420]  ;;  %2056 = vst [vmem:[#allocation1 + $0x20] ss:$2 sm:$0xff] %v2038_v21  ;;  %v2049_v2 = vrot.slane %v2046_v39, 1 }
 0x294   : > { %v2063_v1 = vrot.slane %v2058_v59, 5  ;;  %v2059_v63 = vrot.slane %v2054_v60, 1  ;;  %v3007_v59 = vld [vmem:[%s4163_s7 + $0x28] sm:$0xff]  ;;  %v3006_v39 = vld [vmem:[%s4163_s7 + $0x20] sm:$0xff] }
 0x295   : > { %v2067_v33 = vrot.slane %v2049_v2, 7  ;;  %v3003_v60 = vld [vmem:[%s4163_s7 + $0x8] sm:$0xff] }
 0x296   : > { %v2077_v25 = vsel %vm2076_vm13, %v2062_v37, %v2063_v1  ;;  %v2083_v22 = vsel %vm2082_vm15, %v2062_v37, %v2063_v1  ;;  %v2066_v24 = vrot.slane %v2059_v63, 5  ;;  %v2072_v26 = vsel %vm2071_vm11, %v2062_v37, %v2063_v1  ;;  %v3002_v37 = vld [vmem:[%s4163_s7] sm:$0xff] }
 0x297   : > { %v2079_v18 = vsel %vm2078_vm14, %v2075_v13, %v2077_v25  ;;  %v2085_v53 = vsel %vm2084_vm4, %v2081_v17, %v2083_v22  ;;  %v2073_v28 = vsel %vm620_vm1, %v2070_v9, %v2072_v26  ;;  %v2098_v61 = vsel %vm604_vm0, %v4039_v51, %v2067_v33  ;;  %v3028_v1 = vld [vmem:[%s4162_s6] ss:$0 sm:$0xff] }
 0x298   : > { %v2080_v29 = vrot.slane %v2079_v18, 1  ;;  %v2088_v16 = vsel %vm2071_vm11, %v2065_v48, %v2066_v24  ;;  %v2091_v12 = vsel %vm2076_vm13, %v2065_v48, %v2066_v24  ;;  %v2086_v15 = vrot.slane %v2085_v53, 2 }
 0x299   : > { %v2092_v40 = vsel %vm2078_vm14, %v2090_v31, %v2091_v12  ;;  %v2095_v34 = vsel %vm2082_vm15, %v2065_v48, %v2066_v24  ;;  %v2089_v36 = vsel %vm620_vm1, %v2087_v35, %v2088_v16  ;;  %v2101_v46 = vsel %vm2074_vm12, %v4039_v51, %v2067_v33 }
 0x29a   : > { %v2057_v32 = vld.sshfl [vmem:[#allocation1 + $0x20] sm:$0xff pattern:$0x75316420]  ;;  %v2096_v42 = vsel %vm2084_vm4, %v2094_v19, %v2095_v34  ;;  %v2093_v45 = vrot.slane %v2092_v40, 1  ;;  %v2105_v54 = vsel %vm2071_vm11, %v4039_v51, %v2067_v33  ;;  %v3008_v51 = vld [vmem:[%s4163_s7 + $0x30] sm:$0xff] }
 0x29b   : > { %v2060_v43 = vrot.slane %v2057_v32, 1  ;;  %2109 = vst [vmem:[#allocation1] ss:$9 sm:$0xff] %v2073_v28  ;;  %v2097_v50 = vrot.slane %v2096_v42, 2  ;;  %2537 = vmatpush.bf16.msra.mxu2 %v3008_v51  ;;  %v3029_v34 = vld [vmem:[%s4164_s8] ss:$0 sm:$0xff] }
 0x29c   : > { %2111 = vst [vmem:[#allocation1 + $0x1] ss:$9 sm:$0xff] %v2080_v29 }
 0x29d   : > { %v2069_v3 = vrot.slane %v2060_v43, 5  ;;  %2113 = vst [vmem:[#allocation1 + $0x2] ss:$9 sm:$0xff] %v2086_v15 }
 0x29e   : > { %2115 = vst [vmem:[#allocation1 + $0x3] ss:$9 sm:$0xff] %v2089_v36 }
 0x29f   : > { %v2099_v5 = vsel %vm2071_vm11, %v2068_v6, %v2069_v3  ;;  %v2102_v4 = vsel %vm2076_vm13, %v2068_v6, %v2069_v3  ;;  %2117 = vst [vmem:[#allocation1 + $0x4] ss:$9 sm:$0xff] %v2093_v45  ;;  %v2106_v20 = vsel %vm2082_vm15, %v2068_v6, %v2069_v3  ;;  %2538 = vmatpush.bf16.msra.mxu2 %v3007_v59 }
 0x2a0   : > { %v2100_v47 = vsel %vm620_vm1, %v2098_v61, %v2099_v5  ;;  %v2103_v7 = vsel %vm2078_vm14, %v2101_v46, %v2102_v4  ;;  %2119 = vst [vmem:[#allocation1 + $0x5] ss:$9 sm:$0xff] %v2097_v50  ;;  %v2107_v0 = vsel %vm2084_vm4, %v2105_v54, %v2106_v20 }
 0x2a1   : > { %v2104_v49 = vrot.slane %v2103_v7, 1  ;;  %2121 = vst [vmem:[#allocation1 + $0x6] ss:$9 sm:$0xff] %v2100_v47  ;;  %v2108_v55 = vrot.slane %v2107_v0, 2 }
 0x2a3   : > { %2123 = vst [vmem:[#allocation1 + $0x7] ss:$9 sm:$0xff] %v2104_v49  ;;  %2539 = vmatpush.bf16.msra.mxu2 %v3006_v39 }
 0x2a7   : > { %2540 = vmatpush.bf16.msra.mxu2 %v3005_v8 }
 0x2aa   : > { %v2124_v56 = vld [vmem:[#allocation1] sm:$0xff]  ;;  %v2125_v52 = vld [vmem:[#allocation1 + $0x9] sm:$0xff]  ;;  %v2126_v57 = vld [vmem:[#allocation1 + $0x12] sm:$0xff] }
 0x2ab   : > { %v2127_v11 = vld [vmem:[#allocation1 + $0x1b] sm:$0xff]  ;;  %2541 = vmatpush.bf16.msra.mxu2 %v3004_v23 }
 0x2ac   : > { %2128 = vst [vmem:[#allocation1] ss:$9 sm:$0xff] %v2108_v55 }
 0x2af   : > { %2542 = vmatpush.bf16.msra.mxu2 %v3003_v60 }
 0x2b3   : > { %v2129_v44 = vld [vmem:[#allocation1] sm:$0xff]  ;;  %v2130_v30 = vld [vmem:[#allocation1 + $0x9] sm:$0xff]  ;;  %v2131_v27 = vld [vmem:[#allocation1 + $0x12] sm:$0xff]  ;;  %2543 = vmatpush.bf16.msra.mxu2 %v3002_v37 }
 0x2b4   : > { %v2141_v38 = vpack.c.bf16 %v2129_v44, %v2124_v56  ;;  %v2142_v41 = vpack.c.bf16 %v2130_v30, %v2125_v52  ;;  %v2143_v10 = vpack.c.bf16 %v2131_v27, %v2126_v57  ;;  %v2132_v21 = vld [vmem:[#allocation1 + $0x1b] sm:$0xff] }
 0x2b5   : > { %v2144_v58 = vpack.c.bf16 %v2132_v21, %v2127_v11 }
 0x2b6   : > { %2413 = vmatmul.bf16.vlgmr.msrb.gmra.mxu2 %v2141_v38  ;;  %2427 = vmatmul.bf16.vlgmr.msrb.gmra.mxu3 %v2142_v41 }
 0x2b7   : > { %2441 = vmatmul.bf16.vlgmr.msrb.gmra.mxu0 %v2143_v10  ;;  %2455 = vmatmul.bf16.vlgmr.msra.gmra.mxu1 %v2144_v58 }
 0x334   : > { %v2442_v13 = vpop.f32.mrf.mxu0  ;;  %v2456_v25 = vpop.f32.mrf.mxu1 }
 0x339   : > { %v2414_v62 = vpop.f32.mrf.mxu2  ;;  %v2428_v63 = vpop.f32.mrf.mxu3 }
 0x33a   : > { %v2415_v9 = vadd.f32 %v3028_v1, %v2414_v62 }
 0x33c   : > { %v2429_v48 = vadd.f32 %v2428_v63, %v2415_v9  ;;  %v2444_v2 = vpop.f32.mrf.mxu0  ;;  %v2458_v29 = vpop.f32.mrf.mxu1 }
 0x33e   : > { %v2443_v17 = vadd.f32 %v2442_v13, %v2429_v48 }
 0x340   : > { %v2457_v18 = vadd.f32 %v2456_v25, %v2443_v17 }
 0x341   : > { %v2416_v22 = vpop.f32.mrf.mxu2  ;;  %v2430_v26 = vpop.f32.mrf.mxu3 }
 0x342   : > { %v2417_v24 = vadd.f32 %v3028_v1, %v2416_v22  ;;  %v2463_v31 = vmul.f32 0.01, %v2457_v18  ;;  %vm2461_vm0 = vcmp.ge.f32.partialorder %v2457_v18, 0.0 }
 0x344   : > { %v2431_v53 = vadd.f32 %v2430_v26, %v2417_v24  ;;  %v2465_v15 = vsel %vm2461_vm0, %v2457_v18, %v2463_v31 }
 0x346   : > { %v2445_v14 = vadd.f32 %v2444_v2, %v2431_v53 }
 0x348   : > { %v2459_v16 = vadd.f32 %v2458_v29, %v2445_v14 }
 0x34a   : > { %vm2462_vm1 = vcmp.ge.f32.partialorder %v2459_v16, 0.0  ;;  %v2464_v12 = vmul.f32 0.01, %v2459_v16 }
 0x34c   : > { %v2466_v19 = vsel %vm2462_vm1, %v2459_v16, %v2464_v12 }
 0x34d   : > { %v2467_v40 = vpack.c.bf16 %v2466_v19, %v2465_v15 }
 0x34f   : > { %2544 = vmatmul.bf16.vlgmr.msra.gmra.mxu2 %v2467_v40 }
 0x3d2   : > { %v2545_v28 = vpop.f32.mrf.mxu2 }
 0x3d3   : > { %v2546_v35 = vadd.f32 %v3029_v34, %v2545_v28 }
 0x3d5   : > { %vm2550_vm5 = vcmp.ge.f32.partialorder %v2546_v35, 0.0  ;;  %v2552_v32 = vmul.f32 0.01, %v2546_v35 }
 0x3d7   : > { %v2554_v42 = vsel %vm2550_vm5, %v2546_v35, %v2552_v32 }
 0x3d8   : > { %2556 = vst [vmem:[%s332_s17] sm:$0xff] %v2554_v42 }
 0x3da   : > { %v2547_v43 = vpop.f32.mrf.mxu2 }
 0x3db   : > { %v2548_v33 = vadd.f32 %v3029_v34, %v2547_v43 }
 0x3dd   : > { %vm2551_vm6 = vcmp.ge.f32.partialorder %v2548_v33, 0.0  ;;  %v2553_v36 = vmul.f32 0.01, %v2548_v33 }
 0x3df   : > { %v2555_v45 = vsel %vm2551_vm6, %v2548_v33, %v2553_v36 }
 0x3e0   : > { %2557 = vst [vmem:[%s332_s17 + $0x8] sm:$0x1] %v2555_v45 }
 0x3e1 PF: > { %s19_s30 = sadd.s32 1, %s3036_s30  }
 0x3e2   : > { %p16_p4 = scmp.ge.s32.totalorder %s19_s30, 4  }
 0x3e4   :  { %18 = sbr.rel (!%p16_p4) target bundleno = 1 (0x1), region = 118 }

</bundles_post_ra>
